<compile_context>
chip_gen: v7x
topology: tpu7x:2x2x1
jax: 0.10.0
libtpu: 0.0.40
codegen_flags: <defaults>
</compile_context>

<pallas_src>
import jax
import jax.numpy as jnp
from jax import lax
from jax.experimental import pallas as pl
from jax.experimental.pallas import tpu as pltpu

LEAKY_SLOPE = 0.01
BN_EPS = 1e-5

# (fan_in, fan_out) for the 8 Linear layers, encoder then decoder.
LAYER_DIMS = [(204, 256), (256, 128), (128, 64), (64, 7),
              (7, 64), (64, 128), (128, 256), (256, 204)]


def _pad128(n):
    return ((n + 127) // 128) * 128


PAD_DIMS = [(_pad128(i), _pad128(o)) for (i, o) in LAYER_DIMS]
ROW_OFFSETS = []
_off = 0
for (_ip, _op) in PAD_DIMS:
    ROW_OFFSETS.append(_off)
    _off += _ip
TOTAL_W_ROWS = _off                              # 1408
MAX_OUT = max(op for (_, op) in PAD_DIMS)        # 256
IN_PAD = PAD_DIMS[0][0]                          # 256 (padded input width)
OUT_PAD = PAD_DIMS[-1][1]                        # 256 (padded reconstruction width)
ENC_PAD = PAD_DIMS[3][1]                         # 128 (padded encoded width)


def autoencoder_kernel(x_ref, w_ref, gb_ref, out_ref, enc_ref):
    """Whole forward pass fused in one kernel (everything is VMEM-resident).

    x_ref  : (B, 256)  f32   zero-padded input
    w_ref  : (1408, 256) bf16 all 8 weight matrices, row-stacked, zero-padded
    gb_ref : (16, 256) f32   rows 2*l / 2*l+1 = gamma / beta of layer l (zero-padded)
    out_ref: (B, 256)  f32   padded reconstruction
    enc_ref: (B, 128)  f32   padded encoded features
    """
    h = x_ref[...]  # f32 (B, 256)
    for li in range(8):  # unrolled at trace time
        ip, op = PAD_DIMS[li]
        r0 = ROW_OFFSETS[li]

        w = w_ref[r0:r0 + ip, :op]            # bf16 (ip, op), tile-aligned slice
        gamma = gb_ref[2 * li:2 * li + 1, :op]  # f32 (1, op)
        beta = gb_ref[2 * li + 1:2 * li + 2, :op]

        # Linear (bias omitted: zero-init and cancelled by BN mean subtraction).
        h = jnp.dot(h.astype(jnp.bfloat16), w, preferred_element_type=jnp.float32)

        # BatchNorm1d (training-mode biased batch stats) folded into scale/shift.
        mean = jnp.mean(h, axis=0, keepdims=True)                      # (1, op)
        var = jnp.mean(h * h, axis=0, keepdims=True) - mean * mean
        var = jnp.maximum(var, 0.0)
        inv = lax.rsqrt(var + BN_EPS) * gamma                          # (1, op)
        shift = beta - mean * inv
        h = h * inv + shift

        # LeakyReLU(0.01)
        h = jnp.maximum(h, LEAKY_SLOPE * h)

        if li == 3:  # encoded_features = relu(bn_fc4(encoder_fc4(...)))
            enc_ref[...] = h

    out_ref[...] = h


def init_params(key):
    """Deterministic kaiming-normal(fan_out, leaky_relu) bf16 weights (stored as
    (in, out) for x @ W), fresh BatchNorm affine params (gamma=1, beta=0).
    Linear biases are constant-zero in the PyTorch module and are dropped."""
    gain = 2.0 ** 0.5  # kaiming gain for leaky_relu with default a=0
    weights, gammas, betas = [], [], []
    for (fan_in, fan_out) in LAYER_DIMS:
        key, wk = jax.random.split(key)
        std = gain / (fan_out ** 0.5)  # mode='fan_out'
        w_pt = jax.random.normal(wk, (fan_out, fan_in), jnp.float32) * std
        weights.append(jnp.transpose(w_pt).astype(jnp.bfloat16))  # (in, out)
        gammas.append(jnp.ones((fan_out,), jnp.float32))
        betas.append(jnp.zeros((fan_out,), jnp.float32))
    return weights, gammas, betas


def pack_params(weights, gammas, betas):
    """Pack all weights into one zero-padded bf16 slab and all gamma/beta rows
    into one zero-padded f32 slab (padding lanes MUST stay zero)."""
    w_packed = jnp.zeros((TOTAL_W_ROWS, MAX_OUT), jnp.bfloat16)
    gb_packed = jnp.zeros((16, MAX_OUT), jnp.float32)
    for li, ((fi, fo), r0) in enumerate(zip(LAYER_DIMS, ROW_OFFSETS)):
        w_packed = w_packed.at[r0:r0 + fi, 0:fo].set(weights[li])
        gb_packed = gb_packed.at[2 * li, 0:fo].set(gammas[li])
        gb_packed = gb_packed.at[2 * li + 1, 0:fo].set(betas[li])
    return w_packed, gb_packed


def autoencoder_forward(x, w_packed, gb_packed):
    B, D = x.shape
    assert D == 204
    # Training-mode BatchNorm stats run over the real batch, so the batch axis is
    # NOT padded; keep B a multiple of 8 sublanes for clean layout.
    assert B % 8 == 0, "use a batch size that is a multiple of 8"

    x_pad = jnp.zeros((B, IN_PAD), jnp.float32).at[:, :D].set(x.astype(jnp.float32))

    vmem = pl.BlockSpec(memory_space=pltpu.MemorySpace.VMEM)
    out_pad, enc_pad = pl.pallas_call(
        autoencoder_kernel,
        out_shape=(jax.ShapeDtypeStruct((B, OUT_PAD), jnp.float32),   # reconstruction
                   jax.ShapeDtypeStruct((B, ENC_PAD), jnp.float32)),  # encoded features
        in_specs=[vmem, vmem, vmem],
        out_specs=(vmem, vmem),
        compiler_params=pltpu.CompilerParams(vmem_limit_bytes=32 * 1024 * 1024),
    )(x_pad, w_packed, gb_packed)

    return out_pad[:, :204], enc_pad[:, :7]


def reference_forward(x, weights, gammas, betas):
    """Pure-JAX reference written in the textbook (un-folded, un-padded) form to
    verify the kernel's algebraic rewrites. Uses the same bf16 weights."""
    h = x.astype(jnp.float32)
    enc = None
    for li in range(8):
        h = jnp.dot(h.astype(jnp.bfloat16), weights[li],
                    preferred_element_type=jnp.float32)               # bias == 0
        mean = jnp.mean(h, axis=0, keepdims=True)
        var = jnp.mean((h - mean) ** 2, axis=0, keepdims=True)
        h = (h - mean) * lax.rsqrt(var + BN_EPS) * gammas[li][None, :] + betas[li][None, :]
        h = jnp.where(h > 0, h, LEAKY_SLOPE * h)
        if li == 3:
            enc = h
    return h, enc


if __name__ == "__main__":
    key = jax.random.PRNGKey(0)
    pkey, xkey = jax.random.split(key)
    weights, gammas, betas = init_params(pkey)
    w_packed, gb_packed = pack_params(weights, gammas, betas)

    B = 8
    x = jax.random.normal(xkey, (B, 204), jnp.float32)

    out, enc = autoencoder_forward(x, w_packed, gb_packed)
    jax.block_until_ready((out, enc))

    ref_out, ref_enc = reference_forward(x, weights, gammas, betas)
    assert out.shape == (B, 204) and enc.shape == (B, 7)
    assert jnp.allclose(out, ref_out, atol=1e-3, rtol=1e-3)
    assert jnp.allclose(enc, ref_enc, atol=1e-3, rtol=1e-3)

    print("KERNEL_OK")
</pallas_src>

<mosaic_0001>
module attributes {stable_mosaic.version = 11 : i64} {
  func.func @autoencoder_kernel(%arg0: memref<8x256xf32, #tpu.memory_space<vmem>>, %arg1: memref<1408x256xbf16, #tpu.memory_space<vmem>>, %arg2: memref<16x256xf32, #tpu.memory_space<vmem>>, %arg3: memref<8x256xf32, #tpu.memory_space<vmem>>, %arg4: memref<8x128xf32, #tpu.memory_space<vmem>>) attributes {dimension_semantics = [], scalar_prefetch = 0 : i64, scratch_operands = 0 : i64, tpu.core_type = #tpu.core_type<tc>} {
    %c0 = arith.constant 0 : index
    %c0_0 = arith.constant 0 : index
    %0 = vector.load %arg0[%c0, %c0_0] : memref<8x256xf32, #tpu.memory_space<vmem>>, vector<8x256xf32>
    %c0_1 = arith.constant 0 : index
    %c0_2 = arith.constant 0 : index
    %1 = vector.load %arg1[%c0_1, %c0_2] : memref<1408x256xbf16, #tpu.memory_space<vmem>>, vector<256x256xbf16>
    %c0_3 = arith.constant 0 : index
    %c0_4 = arith.constant 0 : index
    %2 = vector.load %arg2[%c0_3, %c0_4] : memref<16x256xf32, #tpu.memory_space<vmem>>, vector<1x256xf32>
    %c1 = arith.constant 1 : index
    %c0_5 = arith.constant 0 : index
    %3 = vector.load %arg2[%c1, %c0_5] : memref<16x256xf32, #tpu.memory_space<vmem>>, vector<1x256xf32>
    %4 = arith.truncf %0 : vector<8x256xf32> to vector<8x256xbf16>
    %cst = arith.constant dense<0.000000e+00> : vector<8x256xf32>
    %5 = tpu.matmul %4, %1, %cst {dimension_numbers = #tpu.dot_dimension_numbers<[1], [0], [0], [1], [0, 0, 1, 1], [], []>} : vector<8x256xbf16>, vector<256x256xbf16>, vector<8x256xf32> -> vector<8x256xf32>
    %cst_6 = arith.constant dense<0.000000e+00> : vector<256xf32>
    %6 = vector.multi_reduction <add>, %5, %cst_6 [0] : vector<8x256xf32> to vector<256xf32>
    %7 = vector.shape_cast %6 : vector<256xf32> to vector<1x256xf32>
    %cst_7 = arith.constant 8.000000e+00 : f32
    %8 = vector.broadcast %cst_7 : f32 to vector<1x256xf32>
    %9 = arith.divf %7, %8 : vector<1x256xf32>
    %10 = arith.mulf %5, %5 : vector<8x256xf32>
    %cst_8 = arith.constant dense<0.000000e+00> : vector<256xf32>
    %11 = vector.multi_reduction <add>, %10, %cst_8 [0] : vector<8x256xf32> to vector<256xf32>
    %12 = vector.shape_cast %11 : vector<256xf32> to vector<1x256xf32>
    %cst_9 = arith.constant 8.000000e+00 : f32
    %13 = vector.broadcast %cst_9 : f32 to vector<1x256xf32>
    %14 = arith.divf %12, %13 : vector<1x256xf32>
    %15 = arith.mulf %9, %9 : vector<1x256xf32>
    %16 = arith.subf %14, %15 : vector<1x256xf32>
    %cst_10 = arith.constant 0.000000e+00 : f32
    %17 = vector.broadcast %cst_10 : f32 to vector<1x256xf32>
    %18 = arith.maximumf %16, %17 : vector<1x256xf32>
    %cst_11 = arith.constant 9.99999974E-6 : f32
    %19 = vector.broadcast %cst_11 : f32 to vector<1x256xf32>
    %20 = arith.addf %18, %19 : vector<1x256xf32>
    %21 = math.rsqrt %20 : vector<1x256xf32>
    %22 = arith.mulf %21, %2 : vector<1x256xf32>
    %23 = arith.mulf %9, %22 : vector<1x256xf32>
    %24 = arith.subf %3, %23 : vector<1x256xf32>
    %25 = vector.broadcast %22 : vector<1x256xf32> to vector<8x256xf32>
    %26 = arith.mulf %5, %25 : vector<8x256xf32>
    %27 = vector.broadcast %24 : vector<1x256xf32> to vector<8x256xf32>
    %28 = arith.addf %26, %27 : vector<8x256xf32>
    %cst_12 = arith.constant 0.00999999977 : f32
    %29 = vector.broadcast %cst_12 : f32 to vector<8x256xf32>
    %30 = arith.mulf %29, %28 : vector<8x256xf32>
    %31 = arith.maximumf %28, %30 : vector<8x256xf32>
    %c256 = arith.constant 256 : index
    %c0_13 = arith.constant 0 : index
    %32 = vector.load %arg1[%c256, %c0_13] : memref<1408x256xbf16, #tpu.memory_space<vmem>>, vector<256x128xbf16>
    %c2 = arith.constant 2 : index
    %c0_14 = arith.constant 0 : index
    %33 = vector.load %arg2[%c2, %c0_14] : memref<16x256xf32, #tpu.memory_space<vmem>>, vector<1x128xf32>
    %c3 = arith.constant 3 : index
    %c0_15 = arith.constant 0 : index
    %34 = vector.load %arg2[%c3, %c0_15] : memref<16x256xf32, #tpu.memory_space<vmem>>, vector<1x128xf32>
    %35 = arith.truncf %31 : vector<8x256xf32> to vector<8x256xbf16>
    %cst_16 = arith.constant dense<0.000000e+00> : vector<8x128xf32>
    %36 = tpu.matmul %35, %32, %cst_16 {dimension_numbers = #tpu.dot_dimension_numbers<[1], [0], [0], [1], [0, 0, 1, 1], [], []>} : vector<8x256xbf16>, vector<256x128xbf16>, vector<8x128xf32> -> vector<8x128xf32>
    %cst_17 = arith.constant dense<0.000000e+00> : vector<128xf32>
    %37 = vector.multi_reduction <add>, %36, %cst_17 [0] : vector<8x128xf32> to vector<128xf32>
    %38 = vector.shape_cast %37 : vector<128xf32> to vector<1x128xf32>
    %cst_18 = arith.constant 8.000000e+00 : f32
    %39 = vector.broadcast %cst_18 : f32 to vector<1x128xf32>
    %40 = arith.divf %38, %39 : vector<1x128xf32>
    %41 = arith.mulf %36, %36 : vector<8x128xf32>
    %cst_19 = arith.constant dense<0.000000e+00> : vector<128xf32>
    %42 = vector.multi_reduction <add>, %41, %cst_19 [0] : vector<8x128xf32> to vector<128xf32>
    %43 = vector.shape_cast %42 : vector<128xf32> to vector<1x128xf32>
    %cst_20 = arith.constant 8.000000e+00 : f32
    %44 = vector.broadcast %cst_20 : f32 to vector<1x128xf32>
    %45 = arith.divf %43, %44 : vector<1x128xf32>
    %46 = arith.mulf %40, %40 : vector<1x128xf32>
    %47 = arith.subf %45, %46 : vector<1x128xf32>
    %cst_21 = arith.constant 0.000000e+00 : f32
    %48 = vector.broadcast %cst_21 : f32 to vector<1x128xf32>
    %49 = arith.maximumf %47, %48 : vector<1x128xf32>
    %cst_22 = arith.constant 9.99999974E-6 : f32
    %50 = vector.broadcast %cst_22 : f32 to vector<1x128xf32>
    %51 = arith.addf %49, %50 : vector<1x128xf32>
    %52 = math.rsqrt %51 : vector<1x128xf32>
    %53 = arith.mulf %52, %33 : vector<1x128xf32>
    %54 = arith.mulf %40, %53 : vector<1x128xf32>
    %55 = arith.subf %34, %54 : vector<1x128xf32>
    %56 = vector.broadcast %53 : vector<1x128xf32> to vector<8x128xf32>
    %57 = arith.mulf %36, %56 : vector<8x128xf32>
    %58 = vector.broadcast %55 : vector<1x128xf32> to vector<8x128xf32>
    %59 = arith.addf %57, %58 : vector<8x128xf32>
    %cst_23 = arith.constant 0.00999999977 : f32
    %60 = vector.broadcast %cst_23 : f32 to vector<8x128xf32>
    %61 = arith.mulf %60, %59 : vector<8x128xf32>
    %62 = arith.maximumf %59, %61 : vector<8x128xf32>
    %c512 = arith.constant 512 : index
    %c0_24 = arith.constant 0 : index
    %63 = vector.load %arg1[%c512, %c0_24] : memref<1408x256xbf16, #tpu.memory_space<vmem>>, vector<128x128xbf16>
    %c4 = arith.constant 4 : index
    %c0_25 = arith.constant 0 : index
    %64 = vector.load %arg2[%c4, %c0_25] : memref<16x256xf32, #tpu.memory_space<vmem>>, vector<1x128xf32>
    %c5 = arith.constant 5 : index
    %c0_26 = arith.constant 0 : index
    %65 = vector.load %arg2[%c5, %c0_26] : memref<16x256xf32, #tpu.memory_space<vmem>>, vector<1x128xf32>
    %66 = arith.truncf %62 : vector<8x128xf32> to vector<8x128xbf16>
    %cst_27 = arith.constant dense<0.000000e+00> : vector<8x128xf32>
    %67 = tpu.matmul %66, %63, %cst_27 {dimension_numbers = #tpu.dot_dimension_numbers<[1], [0], [0], [1], [0, 0, 1, 1], [], []>} : vector<8x128xbf16>, vector<128x128xbf16>, vector<8x128xf32> -> vector<8x128xf32>
    %cst_28 = arith.constant dense<0.000000e+00> : vector<128xf32>
    %68 = vector.multi_reduction <add>, %67, %cst_28 [0] : vector<8x128xf32> to vector<128xf32>
    %69 = vector.shape_cast %68 : vector<128xf32> to vector<1x128xf32>
    %cst_29 = arith.constant 8.000000e+00 : f32
    %70 = vector.broadcast %cst_29 : f32 to vector<1x128xf32>
    %71 = arith.divf %69, %70 : vector<1x128xf32>
    %72 = arith.mulf %67, %67 : vector<8x128xf32>
    %cst_30 = arith.constant dense<0.000000e+00> : vector<128xf32>
    %73 = vector.multi_reduction <add>, %72, %cst_30 [0] : vector<8x128xf32> to vector<128xf32>
    %74 = vector.shape_cast %73 : vector<128xf32> to vector<1x128xf32>
    %cst_31 = arith.constant 8.000000e+00 : f32
    %75 = vector.broadcast %cst_31 : f32 to vector<1x128xf32>
    %76 = arith.divf %74, %75 : vector<1x128xf32>
    %77 = arith.mulf %71, %71 : vector<1x128xf32>
    %78 = arith.subf %76, %77 : vector<1x128xf32>
    %cst_32 = arith.constant 0.000000e+00 : f32
    %79 = vector.broadcast %cst_32 : f32 to vector<1x128xf32>
    %80 = arith.maximumf %78, %79 : vector<1x128xf32>
    %cst_33 = arith.constant 9.99999974E-6 : f32
    %81 = vector.broadcast %cst_33 : f32 to vector<1x128xf32>
    %82 = arith.addf %80, %81 : vector<1x128xf32>
    %83 = math.rsqrt %82 : vector<1x128xf32>
    %84 = arith.mulf %83, %64 : vector<1x128xf32>
    %85 = arith.mulf %71, %84 : vector<1x128xf32>
    %86 = arith.subf %65, %85 : vector<1x128xf32>
    %87 = vector.broadcast %84 : vector<1x128xf32> to vector<8x128xf32>
    %88 = arith.mulf %67, %87 : vector<8x128xf32>
    %89 = vector.broadcast %86 : vector<1x128xf32> to vector<8x128xf32>
    %90 = arith.addf %88, %89 : vector<8x128xf32>
    %cst_34 = arith.constant 0.00999999977 : f32
    %91 = vector.broadcast %cst_34 : f32 to vector<8x128xf32>
    %92 = arith.mulf %91, %90 : vector<8x128xf32>
    %93 = arith.maximumf %90, %92 : vector<8x128xf32>
    %c640 = arith.constant 640 : index
    %c0_35 = arith.constant 0 : index
    %94 = vector.load %arg1[%c640, %c0_35] : memref<1408x256xbf16, #tpu.memory_space<vmem>>, vector<128x128xbf16>
    %c6 = arith.constant 6 : index
    %c0_36 = arith.constant 0 : index
    %95 = vector.load %arg2[%c6, %c0_36] : memref<16x256xf32, #tpu.memory_space<vmem>>, vector<1x128xf32>
    %c7 = arith.constant 7 : index
    %c0_37 = arith.constant 0 : index
    %96 = vector.load %arg2[%c7, %c0_37] : memref<16x256xf32, #tpu.memory_space<vmem>>, vector<1x128xf32>
    %97 = arith.truncf %93 : vector<8x128xf32> to vector<8x128xbf16>
    %cst_38 = arith.constant dense<0.000000e+00> : vector<8x128xf32>
    %98 = tpu.matmul %97, %94, %cst_38 {dimension_numbers = #tpu.dot_dimension_numbers<[1], [0], [0], [1], [0, 0, 1, 1], [], []>} : vector<8x128xbf16>, vector<128x128xbf16>, vector<8x128xf32> -> vector<8x128xf32>
    %cst_39 = arith.constant dense<0.000000e+00> : vector<128xf32>
    %99 = vector.multi_reduction <add>, %98, %cst_39 [0] : vector<8x128xf32> to vector<128xf32>
    %100 = vector.shape_cast %99 : vector<128xf32> to vector<1x128xf32>
    %cst_40 = arith.constant 8.000000e+00 : f32
    %101 = vector.broadcast %cst_40 : f32 to vector<1x128xf32>
    %102 = arith.divf %100, %101 : vector<1x128xf32>
    %103 = arith.mulf %98, %98 : vector<8x128xf32>
    %cst_41 = arith.constant dense<0.000000e+00> : vector<128xf32>
    %104 = vector.multi_reduction <add>, %103, %cst_41 [0] : vector<8x128xf32> to vector<128xf32>
    %105 = vector.shape_cast %104 : vector<128xf32> to vector<1x128xf32>
    %cst_42 = arith.constant 8.000000e+00 : f32
    %106 = vector.broadcast %cst_42 : f32 to vector<1x128xf32>
    %107 = arith.divf %105, %106 : vector<1x128xf32>
    %108 = arith.mulf %102, %102 : vector<1x128xf32>
    %109 = arith.subf %107, %108 : vector<1x128xf32>
    %cst_43 = arith.constant 0.000000e+00 : f32
    %110 = vector.broadcast %cst_43 : f32 to vector<1x128xf32>
    %111 = arith.maximumf %109, %110 : vector<1x128xf32>
    %cst_44 = arith.constant 9.99999974E-6 : f32
    %112 = vector.broadcast %cst_44 : f32 to vector<1x128xf32>
    %113 = arith.addf %111, %112 : vector<1x128xf32>
    %114 = math.rsqrt %113 : vector<1x128xf32>
    %115 = arith.mulf %114, %95 : vector<1x128xf32>
    %116 = arith.mulf %102, %115 : vector<1x128xf32>
    %117 = arith.subf %96, %116 : vector<1x128xf32>
    %118 = vector.broadcast %115 : vector<1x128xf32> to vector<8x128xf32>
    %119 = arith.mulf %98, %118 : vector<8x128xf32>
    %120 = vector.broadcast %117 : vector<1x128xf32> to vector<8x128xf32>
    %121 = arith.addf %119, %120 : vector<8x128xf32>
    %cst_45 = arith.constant 0.00999999977 : f32
    %122 = vector.broadcast %cst_45 : f32 to vector<8x128xf32>
    %123 = arith.mulf %122, %121 : vector<8x128xf32>
    %124 = arith.maximumf %121, %123 : vector<8x128xf32>
    %c0_46 = arith.constant 0 : index
    %c0_47 = arith.constant 0 : index
    %125 = vector.load %arg4[%c0_46, %c0_47] : memref<8x128xf32, #tpu.memory_space<vmem>>, vector<8x128xf32>
    tpu.vector_store %arg4[%c0_46, %c0_47], %124 {strides = array<i32>} : memref<8x128xf32, #tpu.memory_space<vmem>>, vector<8x128xf32>,
    %c768 = arith.constant 768 : index
    %c0_48 = arith.constant 0 : index
    %126 = vector.load %arg1[%c768, %c0_48] : memref<1408x256xbf16, #tpu.memory_space<vmem>>, vector<128x128xbf16>
    %c8 = arith.constant 8 : index
    %c0_49 = arith.constant 0 : index
    %127 = vector.load %arg2[%c8, %c0_49] : memref<16x256xf32, #tpu.memory_space<vmem>>, vector<1x128xf32>
    %c9 = arith.constant 9 : index
    %c0_50 = arith.constant 0 : index
    %128 = vector.load %arg2[%c9, %c0_50] : memref<16x256xf32, #tpu.memory_space<vmem>>, vector<1x128xf32>
    %129 = arith.truncf %124 : vector<8x128xf32> to vector<8x128xbf16>
    %cst_51 = arith.constant dense<0.000000e+00> : vector<8x128xf32>
    %130 = tpu.matmul %129, %126, %cst_51 {dimension_numbers = #tpu.dot_dimension_numbers<[1], [0], [0], [1], [0, 0, 1, 1], [], []>} : vector<8x128xbf16>, vector<128x128xbf16>, vector<8x128xf32> -> vector<8x128xf32>
    %cst_52 = arith.constant dense<0.000000e+00> : vector<128xf32>
    %131 = vector.multi_reduction <add>, %130, %cst_52 [0] : vector<8x128xf32> to vector<128xf32>
    %132 = vector.shape_cast %131 : vector<128xf32> to vector<1x128xf32>
    %cst_53 = arith.constant 8.000000e+00 : f32
    %133 = vector.broadcast %cst_53 : f32 to vector<1x128xf32>
    %134 = arith.divf %132, %133 : vector<1x128xf32>
    %135 = arith.mulf %130, %130 : vector<8x128xf32>
    %cst_54 = arith.constant dense<0.000000e+00> : vector<128xf32>
    %136 = vector.multi_reduction <add>, %135, %cst_54 [0] : vector<8x128xf32> to vector<128xf32>
    %137 = vector.shape_cast %136 : vector<128xf32> to vector<1x128xf32>
    %cst_55 = arith.constant 8.000000e+00 : f32
    %138 = vector.broadcast %cst_55 : f32 to vector<1x128xf32>
    %139 = arith.divf %137, %138 : vector<1x128xf32>
    %140 = arith.mulf %134, %134 : vector<1x128xf32>
    %141 = arith.subf %139, %140 : vector<1x128xf32>
    %cst_56 = arith.constant 0.000000e+00 : f32
    %142 = vector.broadcast %cst_56 : f32 to vector<1x128xf32>
    %143 = arith.maximumf %141, %142 : vector<1x128xf32>
    %cst_57 = arith.constant 9.99999974E-6 : f32
    %144 = vector.broadcast %cst_57 : f32 to vector<1x128xf32>
    %145 = arith.addf %143, %144 : vector<1x128xf32>
    %146 = math.rsqrt %145 : vector<1x128xf32>
    %147 = arith.mulf %146, %127 : vector<1x128xf32>
    %148 = arith.mulf %134, %147 : vector<1x128xf32>
    %149 = arith.subf %128, %148 : vector<1x128xf32>
    %150 = vector.broadcast %147 : vector<1x128xf32> to vector<8x128xf32>
    %151 = arith.mulf %130, %150 : vector<8x128xf32>
    %152 = vector.broadcast %149 : vector<1x128xf32> to vector<8x128xf32>
    %153 = arith.addf %151, %152 : vector<8x128xf32>
    %cst_58 = arith.constant 0.00999999977 : f32
    %154 = vector.broadcast %cst_58 : f32 to vector<8x128xf32>
    %155 = arith.mulf %154, %153 : vector<8x128xf32>
    %156 = arith.maximumf %153, %155 : vector<8x128xf32>
    %c896 = arith.constant 896 : index
    %c0_59 = arith.constant 0 : index
    %157 = vector.load %arg1[%c896, %c0_59] : memref<1408x256xbf16, #tpu.memory_space<vmem>>, vector<128x128xbf16>
    %c10 = arith.constant 10 : index
    %c0_60 = arith.constant 0 : index
    %158 = vector.load %arg2[%c10, %c0_60] : memref<16x256xf32, #tpu.memory_space<vmem>>, vector<1x128xf32>
    %c11 = arith.constant 11 : index
    %c0_61 = arith.constant 0 : index
    %159 = vector.load %arg2[%c11, %c0_61] : memref<16x256xf32, #tpu.memory_space<vmem>>, vector<1x128xf32>
    %160 = arith.truncf %156 : vector<8x128xf32> to vector<8x128xbf16>
    %cst_62 = arith.constant dense<0.000000e+00> : vector<8x128xf32>
    %161 = tpu.matmul %160, %157, %cst_62 {dimension_numbers = #tpu.dot_dimension_numbers<[1], [0], [0], [1], [0, 0, 1, 1], [], []>} : vector<8x128xbf16>, vector<128x128xbf16>, vector<8x128xf32> -> vector<8x128xf32>
    %cst_63 = arith.constant dense<0.000000e+00> : vector<128xf32>
    %162 = vector.multi_reduction <add>, %161, %cst_63 [0] : vector<8x128xf32> to vector<128xf32>
    %163 = vector.shape_cast %162 : vector<128xf32> to vector<1x128xf32>
    %cst_64 = arith.constant 8.000000e+00 : f32
    %164 = vector.broadcast %cst_64 : f32 to vector<1x128xf32>
    %165 = arith.divf %163, %164 : vector<1x128xf32>
    %166 = arith.mulf %161, %161 : vector<8x128xf32>
    %cst_65 = arith.constant dense<0.000000e+00> : vector<128xf32>
    %167 = vector.multi_reduction <add>, %166, %cst_65 [0] : vector<8x128xf32> to vector<128xf32>
    %168 = vector.shape_cast %167 : vector<128xf32> to vector<1x128xf32>
    %cst_66 = arith.constant 8.000000e+00 : f32
    %169 = vector.broadcast %cst_66 : f32 to vector<1x128xf32>
    %170 = arith.divf %168, %169 : vector<1x128xf32>
    %171 = arith.mulf %165, %165 : vector<1x128xf32>
    %172 = arith.subf %170, %171 : vector<1x128xf32>
    %cst_67 = arith.constant 0.000000e+00 : f32
    %173 = vector.broadcast %cst_67 : f32 to vector<1x128xf32>
    %174 = arith.maximumf %172, %173 : vector<1x128xf32>
    %cst_68 = arith.constant 9.99999974E-6 : f32
    %175 = vector.broadcast %cst_68 : f32 to vector<1x128xf32>
    %176 = arith.addf %174, %175 : vector<1x128xf32>
    %177 = math.rsqrt %176 : vector<1x128xf32>
    %178 = arith.mulf %177, %158 : vector<1x128xf32>
    %179 = arith.mulf %165, %178 : vector<1x128xf32>
    %180 = arith.subf %159, %179 : vector<1x128xf32>
    %181 = vector.broadcast %178 : vector<1x128xf32> to vector<8x128xf32>
    %182 = arith.mulf %161, %181 : vector<8x128xf32>
    %183 = vector.broadcast %180 : vector<1x128xf32> to vector<8x128xf32>
    %184 = arith.addf %182, %183 : vector<8x128xf32>
    %cst_69 = arith.constant 0.00999999977 : f32
    %185 = vector.broadcast %cst_69 : f32 to vector<8x128xf32>
    %186 = arith.mulf %185, %184 : vector<8x128xf32>
    %187 = arith.maximumf %184, %186 : vector<8x128xf32>
    %c1024 = arith.constant 1024 : index
    %c0_70 = arith.constant 0 : index
    %188 = vector.load %arg1[%c1024, %c0_70] : memref<1408x256xbf16, #tpu.memory_space<vmem>>, vector<128x256xbf16>
    %c12 = arith.constant 12 : index
    %c0_71 = arith.constant 0 : index
    %189 = vector.load %arg2[%c12, %c0_71] : memref<16x256xf32, #tpu.memory_space<vmem>>, vector<1x256xf32>
    %c13 = arith.constant 13 : index
    %c0_72 = arith.constant 0 : index
    %190 = vector.load %arg2[%c13, %c0_72] : memref<16x256xf32, #tpu.memory_space<vmem>>, vector<1x256xf32>
    %191 = arith.truncf %187 : vector<8x128xf32> to vector<8x128xbf16>
    %cst_73 = arith.constant dense<0.000000e+00> : vector<8x256xf32>
    %192 = tpu.matmul %191, %188, %cst_73 {dimension_numbers = #tpu.dot_dimension_numbers<[1], [0], [0], [1], [0, 0, 1, 1], [], []>} : vector<8x128xbf16>, vector<128x256xbf16>, vector<8x256xf32> -> vector<8x256xf32>
    %cst_74 = arith.constant dense<0.000000e+00> : vector<256xf32>
    %193 = vector.multi_reduction <add>, %192, %cst_74 [0] : vector<8x256xf32> to vector<256xf32>
    %194 = vector.shape_cast %193 : vector<256xf32> to vector<1x256xf32>
    %cst_75 = arith.constant 8.000000e+00 : f32
    %195 = vector.broadcast %cst_75 : f32 to vector<1x256xf32>
    %196 = arith.divf %194, %195 : vector<1x256xf32>
    %197 = arith.mulf %192, %192 : vector<8x256xf32>
    %cst_76 = arith.constant dense<0.000000e+00> : vector<256xf32>
    %198 = vector.multi_reduction <add>, %197, %cst_76 [0] : vector<8x256xf32> to vector<256xf32>
    %199 = vector.shape_cast %198 : vector<256xf32> to vector<1x256xf32>
    %cst_77 = arith.constant 8.000000e+00 : f32
    %200 = vector.broadcast %cst_77 : f32 to vector<1x256xf32>
    %201 = arith.divf %199, %200 : vector<1x256xf32>
    %202 = arith.mulf %196, %196 : vector<1x256xf32>
    %203 = arith.subf %201, %202 : vector<1x256xf32>
    %cst_78 = arith.constant 0.000000e+00 : f32
    %204 = vector.broadcast %cst_78 : f32 to vector<1x256xf32>
    %205 = arith.maximumf %203, %204 : vector<1x256xf32>
    %cst_79 = arith.constant 9.99999974E-6 : f32
    %206 = vector.broadcast %cst_79 : f32 to vector<1x256xf32>
    %207 = arith.addf %205, %206 : vector<1x256xf32>
    %208 = math.rsqrt %207 : vector<1x256xf32>
    %209 = arith.mulf %208, %189 : vector<1x256xf32>
    %210 = arith.mulf %196, %209 : vector<1x256xf32>
    %211 = arith.subf %190, %210 : vector<1x256xf32>
    %212 = vector.broadcast %209 : vector<1x256xf32> to vector<8x256xf32>
    %213 = arith.mulf %192, %212 : vector<8x256xf32>
    %214 = vector.broadcast %211 : vector<1x256xf32> to vector<8x256xf32>
    %215 = arith.addf %213, %214 : vector<8x256xf32>
    %cst_80 = arith.constant 0.00999999977 : f32
    %216 = vector.broadcast %cst_80 : f32 to vector<8x256xf32>
    %217 = arith.mulf %216, %215 : vector<8x256xf32>
    %218 = arith.maximumf %215, %217 : vector<8x256xf32>
    %c1152 = arith.constant 1152 : index
    %c0_81 = arith.constant 0 : index
    %219 = vector.load %arg1[%c1152, %c0_81] : memref<1408x256xbf16, #tpu.memory_space<vmem>>, vector<256x256xbf16>
    %c14 = arith.constant 14 : index
    %c0_82 = arith.constant 0 : index
    %220 = vector.load %arg2[%c14, %c0_82] : memref<16x256xf32, #tpu.memory_space<vmem>>, vector<1x256xf32>
    %c15 = arith.constant 15 : index
    %c0_83 = arith.constant 0 : index
    %221 = vector.load %arg2[%c15, %c0_83] : memref<16x256xf32, #tpu.memory_space<vmem>>, vector<1x256xf32>
    %222 = arith.truncf %218 : vector<8x256xf32> to vector<8x256xbf16>
    %cst_84 = arith.constant dense<0.000000e+00> : vector<8x256xf32>
    %223 = tpu.matmul %222, %219, %cst_84 {dimension_numbers = #tpu.dot_dimension_numbers<[1], [0], [0], [1], [0, 0, 1, 1], [], []>} : vector<8x256xbf16>, vector<256x256xbf16>, vector<8x256xf32> -> vector<8x256xf32>
    %cst_85 = arith.constant dense<0.000000e+00> : vector<256xf32>
    %224 = vector.multi_reduction <add>, %223, %cst_85 [0] : vector<8x256xf32> to vector<256xf32>
    %225 = vector.shape_cast %224 : vector<256xf32> to vector<1x256xf32>
    %cst_86 = arith.constant 8.000000e+00 : f32
    %226 = vector.broadcast %cst_86 : f32 to vector<1x256xf32>
    %227 = arith.divf %225, %226 : vector<1x256xf32>
    %228 = arith.mulf %223, %223 : vector<8x256xf32>
    %cst_87 = arith.constant dense<0.000000e+00> : vector<256xf32>
    %229 = vector.multi_reduction <add>, %228, %cst_87 [0] : vector<8x256xf32> to vector<256xf32>
    %230 = vector.shape_cast %229 : vector<256xf32> to vector<1x256xf32>
    %cst_88 = arith.constant 8.000000e+00 : f32
    %231 = vector.broadcast %cst_88 : f32 to vector<1x256xf32>
    %232 = arith.divf %230, %231 : vector<1x256xf32>
    %233 = arith.mulf %227, %227 : vector<1x256xf32>
    %234 = arith.subf %232, %233 : vector<1x256xf32>
    %cst_89 = arith.constant 0.000000e+00 : f32
    %235 = vector.broadcast %cst_89 : f32 to vector<1x256xf32>
    %236 = arith.maximumf %234, %235 : vector<1x256xf32>
    %cst_90 = arith.constant 9.99999974E-6 : f32
    %237 = vector.broadcast %cst_90 : f32 to vector<1x256xf32>
    %238 = arith.addf %236, %237 : vector<1x256xf32>
    %239 = math.rsqrt %238 : vector<1x256xf32>
    %240 = arith.mulf %239, %220 : vector<1x256xf32>
    %241 = arith.mulf %227, %240 : vector<1x256xf32>
    %242 = arith.subf %221, %241 : vector<1x256xf32>
    %243 = vector.broadcast %240 : vector<1x256xf32> to vector<8x256xf32>
    %244 = arith.mulf %223, %243 : vector<8x256xf32>
    %245 = vector.broadcast %242 : vector<1x256xf32> to vector<8x256xf32>
    %246 = arith.addf %244, %245 : vector<8x256xf32>
    %cst_91 = arith.constant 0.00999999977 : f32
    %247 = vector.broadcast %cst_91 : f32 to vector<8x256xf32>
    %248 = arith.mulf %247, %246 : vector<8x256xf32>
    %249 = arith.maximumf %246, %248 : vector<8x256xf32>
    %c0_92 = arith.constant 0 : index
    %c0_93 = arith.constant 0 : index
    %250 = vector.load %arg3[%c0_92, %c0_93] : memref<8x256xf32, #tpu.memory_space<vmem>>, vector<8x256xf32>
    tpu.vector_store %arg3[%c0_92, %c0_93], %249 {strides = array<i32>} : memref<8x256xf32, #tpu.memory_space<vmem>>, vector<8x256xf32>,
    return
  }
}

</mosaic_0001>

<bundles_post_ra>
// kernel: tpu_custom_call.1
= control target key start
LH: loop header
LB: loop body
LE: loop exit
PB: predicated region body
PF: predicated region fallthrough
CT: control target
= control target key end

     0   :  { %10 = vsyncpa [#allocation3], 0  ;;  %s2520_s0 = inlined_call_operand.hbm [shape: f32[8,256], index: 0, kind: input, shape index: {}]   ;;  %s2521_s1 = inlined_call_operand.hbm [shape: bf16[1408,256], index: 1, kind: input, shape index: {}]   ;;  %s2522_s2 = inlined_call_operand.hbm [shape: f32[16,256], index: 2, kind: input, shape index: {}]   ;;  %s2523_s3 = inlined_call_operand.hbm [shape: f32[8,256], index: 3, kind: output, shape index: {0}]   ;;  %s2524_s4 = inlined_call_operand.hbm [shape: f32[8,128], index: 4, kind: output, shape index: {1}]  }
   0x1   :  { %11 = vsyncpa [#allocation6], 0 }
   0x2   :  { %12 = vsyncpa [#allocation4], 0 }
   0x3   :  { %13 = vsyncpa [#allocation10], 0  ;;  %s2338_s15 = smov [#allocation5]   ;;  %s2220_s19 = scalar_lea.hbm %s2521_s1, 22528 }
   0x4   :  { %s29_s16 = sshll.u32 %s2338_s15, 4  ;;  %p2221_p0 = scmp.ne.s32.totalorder %s2521_s1, %s2220_s19  ;;  %s30_s16 = int_to_ptr.vmem [resolvable:$true] %s29_s16 }
   0x5   :  { %p2224_p1 = scmp.lt.u32.totalorder %s2220_s19, %s2521_s1 }
   0x7   :  { %p2226_p2 = pnand %p2224_p1, %p2221_p0 }
   0x9   :  { %2229 = shalt.err (!%p2226_p2)
}
   0xa   :  { %s2230_s24 = scalar_lea.vmem %s30_s16, 22528  ;;  %p2235_p4 = scmp.lt.s32.totalorder %s30_s16, %s30_s16 }
   0xb   :  { %p2231_p3 = scmp.ne.s32.totalorder %s30_s16, %s2230_s24  ;;  %p2236_p5 = scmp.lt.s32.totalorder %s2230_s24, %s2230_s24 }
   0xd   :  { %p2237_p6 = por %p2236_p5, %p2235_p4 }
   0xf   :  { %p2238_p7 = pnand %p2237_p6, %p2231_p3 }
  0x11   :  { %2241 = shalt.err (!%p2238_p7)
}
  0x12   :  { %s2339_s25 = smov 128   ;;  %s2340_s26 = smov 8  }
  0x13   :  { %35 = dma.hbm_to_vmem [thread:$0]  %s2521_s1, 22528, %s30_s16, [#allocation6], %s2339_s25, %s2339_s25, %s2340_s26  }
  0x14   :  { %s2341_s29 = smov [#allocation2]   ;;  %s2342_s5 = smov [#allocation7]  }
  0x15   :  { %s20_s30 = sshll.u32 %s2341_s29, 4  ;;  %s41_s6 = sshll.u32 %s2342_s5, 4  ;;  %s21_s30 = int_to_ptr.vmem [resolvable:$true] %s20_s30  ;;  %s42_s6 = int_to_ptr.vmem [resolvable:$true] %s41_s6 }
  0x16   :  { %s2242_s9 = scalar_lea.hbm %s2520_s0, 256 }
  0x17   :  { %p2243_p8 = scmp.ne.s32.totalorder %s2520_s0, %s2242_s9  ;;  %p2246_p9 = scmp.lt.u32.totalorder %s2242_s9, %s2520_s0 }
  0x19   :  { %p2248_p10 = pnand %p2246_p9, %p2243_p8 }
  0x1b   :  { %2251 = shalt.err (!%p2248_p10)
}
  0x1c   :  { %s2252_s1 = scalar_lea.vmem %s21_s30, 256  ;;  %p2257_p12 = scmp.lt.s32.totalorder %s21_s30, %s21_s30 }
  0x1d   :  { %p2253_p11 = scmp.ne.s32.totalorder %s21_s30, %s2252_s1  ;;  %p2258_p13 = scmp.lt.s32.totalorder %s2252_s1, %s2252_s1 }
  0x1f   :  { %p2259_p0 = por %p2258_p13, %p2257_p12 }
  0x21   :  { %p2260_p1 = pnand %p2259_p0, %p2253_p11 }
  0x23   :  { %2263 = shalt.err (!%p2260_p1)
}
  0x24   :  { %23 = dma.hbm_to_vmem [thread:$0]  %s2520_s0, 256, %s21_s30, [#allocation3]  }
  0x25   :  { %s2264_s18 = scalar_lea.hbm %s2522_s2, 512 }
  0x26   :  { %p2265_p2 = scmp.ne.s32.totalorder %s2522_s2, %s2264_s18  ;;  %p2268_p3 = scmp.lt.u32.totalorder %s2264_s18, %s2522_s2 }
  0x28   :  { %p2270_p4 = pnand %p2268_p3, %p2265_p2 }
  0x2a   :  { %2273 = shalt.err (!%p2270_p4)
}
  0x2b   :  { %s2274_s23 = scalar_lea.vmem %s42_s6, 512  ;;  %p2279_p6 = scmp.lt.s32.totalorder %s42_s6, %s42_s6 }
  0x2c   :  { %p2275_p5 = scmp.ne.s32.totalorder %s42_s6, %s2274_s23  ;;  %p2280_p7 = scmp.lt.s32.totalorder %s2274_s23, %s2274_s23 }
  0x2e   :  { %p2281_p8 = por %p2280_p7, %p2279_p6 }
  0x30   :  { %p2282_p9 = pnand %p2281_p8, %p2275_p5 }
  0x32   :  { %2285 = shalt.err (!%p2282_p9)
}
  0x33   :  { %s2343_s0 = smov 256   ;;  %s2344_s24 = smov 16  }
  0x34   :  { %47 = dma.hbm_to_vmem [thread:$0]  %s2522_s2, 512, %s42_s6, [#allocation6], %s2343_s0, %s2343_s0, %s2344_s24  }
  0x35   :  { %2330 = dma.done.wait [#allocation3], 256  }
  0x36   :  { %2331 = vsyncadd [#allocation3], 4294967040 }
  0x37   :  { %2332 = dma.done.wait [#allocation6], 23040  }
  0x38   :  { %2333 = vsyncadd [#allocation6], 4294944256  ;;  %v2030_v0 = vld [vmem:[#allocation5 + $0x4] ss:$8 sps:$4 sm:$0xff]   ;;  %v2032_v1 = vld [vmem:[#allocation5] ss:$8 sps:$4 sm:$0xff]  }
  0x39   :  { %257 = vmatprep.subr.bf16.mxu0 %v2030_v0  ;;  %v2033_v2 = vld [vmem:[#allocation5 + $0x14] ss:$8 sps:$4 sm:$0xff]   ;;  %v2035_v3 = vld [vmem:[#allocation5 + $0x10] ss:$8 sps:$4 sm:$0xff]   ;;  %v2036_v4 = vld [vmem:[#allocation5 + $0x24] ss:$8 sps:$4 sm:$0xff]  }
  0x3a   :  { %258 = vmatpush1.bf16.msra.mxu0 %v2032_v1  ;;  %v2038_v5 = vld [vmem:[#allocation5 + $0x20] ss:$8 sps:$4 sm:$0xff]   ;;  %v2039_v6 = vld [vmem:[#allocation5 + $0x34] ss:$8 sps:$4 sm:$0xff]   ;;  %v2041_v7 = vld [vmem:[#allocation5 + $0x30] ss:$8 sps:$4 sm:$0xff]  }
  0x3b   :  { %259 = vmatprep.subr.bf16.mxu0 %v2033_v2  ;;  %v2042_v8 = vld [vmem:[#allocation5 + $0x44] ss:$8 sps:$4 sm:$0xff]   ;;  %v2044_v9 = vld [vmem:[#allocation5 + $0x40] ss:$8 sps:$4 sm:$0xff]   ;;  %v2045_v10 = vld [vmem:[#allocation5 + $0x54] ss:$8 sps:$4 sm:$0xff]  }
  0x3c   :  { %v2047_v11 = vld [vmem:[#allocation5 + $0x50] ss:$8 sps:$4 sm:$0xff]   ;;  %v2048_v12 = vld [vmem:[#allocation5 + $0x64] ss:$8 sps:$4 sm:$0xff]   ;;  %v2050_v13 = vld [vmem:[#allocation5 + $0x60] ss:$8 sps:$4 sm:$0xff]  }
  0x3d   :  { %v59_v14 = vld [vmem:[#allocation2 + $0x8] sm:$0xff]  ;;  %v2054_v18 = vld [vmem:[#allocation5 + $0x84] ss:$8 sps:$4 sm:$0xff]   ;;  %v2056_v19 = vld [vmem:[#allocation5 + $0x80] ss:$8 sps:$4 sm:$0xff]   ;;  %vm2347_vm0 = vmmov 0  }
  0x3e   :  { %260 = vmatpush1.bf16.msra.mxu0 %v2035_v3  ;;  %v2051_v15 = vld [vmem:[#allocation5 + $0x74] ss:$8 sps:$4 sm:$0xff]   ;;  %v96_v16 = vpack.c.bf16 %v59_v14, %v59_v14  ;;  %v2053_v17 = vld [vmem:[#allocation5 + $0x70] ss:$8 sps:$4 sm:$0xff]   ;;  %v2060_v22 = vld [vmem:[#allocation5 + $0xa4] ss:$8 sps:$4 sm:$0xff]  }
  0x3f   :  { %261 = vmatprep.subr.bf16.mxu0 %v2036_v4  ;;  %v2057_v20 = vld [vmem:[#allocation5 + $0x94] ss:$8 sps:$4 sm:$0xff]   ;;  %v2059_v21 = vld [vmem:[#allocation5 + $0x90] ss:$8 sps:$4 sm:$0xff]   ;;  %v2062_v23 = vld [vmem:[#allocation5 + $0xa0] ss:$8 sps:$4 sm:$0xff]  }
  0x40   :  { %289 = vmatprep.mubr.bf16.mxu0 %v96_v16  ;;  %v2063_v24 = vld [vmem:[#allocation5 + $0xb4] ss:$8 sps:$4 sm:$0xff]   ;;  %v2065_v25 = vld [vmem:[#allocation5 + $0xb0] ss:$8 sps:$4 sm:$0xff]   ;;  %v2066_v26 = vld [vmem:[#allocation5 + $0xc4] ss:$8 sps:$4 sm:$0xff]  }
  0x41   :  { %v2068_v27 = vld [vmem:[#allocation5 + $0xc0] ss:$8 sps:$4 sm:$0xff]   ;;  %v2069_v28 = vld [vmem:[#allocation5 + $0xd4] ss:$8 sps:$4 sm:$0xff]   ;;  %v2071_v29 = vld [vmem:[#allocation5 + $0xd0] ss:$8 sps:$4 sm:$0xff]  }
  0x42   :  { %262 = vmatpush1.bf16.msra.mxu0 %v2038_v5  ;;  %v2072_v30 = vld [vmem:[#allocation5 + $0xe4] ss:$8 sps:$4 sm:$0xff]   ;;  %v2074_v31 = vld [vmem:[#allocation5 + $0xe0] ss:$8 sps:$4 sm:$0xff]   ;;  %v2075_v32 = vld [vmem:[#allocation5 + $0xf4] ss:$8 sps:$4 sm:$0xff]  }
  0x43   :  { %263 = vmatprep.subr.bf16.mxu0 %v2039_v6  ;;  %v2077_v33 = vld [vmem:[#allocation5 + $0xf0] ss:$8 sps:$4 sm:$0xff]   ;;  %v2078_v36 = vld [vmem:[#allocation5 + $0x180] ss:$8 sps:$4 sm:$0xff]   ;;  %s2349_s2 = smov [#allocation9]  }
  0x44   :  { %v58_v34 = vld [vmem:[#allocation2] sm:$0xff]  ;;  %v2079_v37 = vld [vmem:[#allocation5 + $0x100] ss:$8 sps:$4 sm:$0xff]   ;;  %1879 = vmatprep.subr.bf16.mxu1 %v2078_v36  ;;  %s1737_s27 = sshll.u32 %s2349_s2, 4  ;;  %s1738_s27 = int_to_ptr.vmem [resolvable:$true] %s1737_s27 }
  0x45   :  { %v95_v35 = vpack.c.bf16 %v58_v34, %v58_v34  ;;  %1880 = vmatpush3.bf16.msra.mxu1 %v2079_v37  ;;  %v2080_v38 = vld [vmem:[#allocation5 + $0x190] ss:$8 sps:$4 sm:$0xff]   ;;  %v2082_v40 = vld [vmem:[#allocation5 + $0x1a0] ss:$8 sps:$4 sm:$0xff]   ;;  %s2286_s28 = scalar_lea.vmem %s1738_s27, 128  ;;  %p2291_p11 = scmp.lt.s32.totalorder %s1738_s27, %s1738_s27 }
  0x46   :  { %264 = vmatpush1.bf16.msra.mxu0 %v2041_v7  ;;  %v2081_v39 = vld [vmem:[#allocation5 + $0x110] ss:$8 sps:$4 sm:$0xff]   ;;  %1881 = vmatprep.subr.bf16.mxu1 %v2080_v38  ;;  %v2083_v41 = vld [vmem:[#allocation5 + $0x120] ss:$8 sps:$4 sm:$0xff]   ;;  %p2287_p10 = scmp.ne.s32.totalorder %s1738_s27, %s2286_s28  ;;  %p2292_p12 = scmp.lt.s32.totalorder %s2286_s28, %s2286_s28 }
  0x47   :  { %265 = vmatprep.subr.bf16.mxu0 %v2042_v8  ;;  %v2084_v42 = vld [vmem:[#allocation5 + $0x1b0] ss:$8 sps:$4 sm:$0xff]   ;;  %v2086_v44 = vld [vmem:[#allocation5 + $0x1c0] ss:$8 sps:$4 sm:$0xff]  }
  0x48   :  { %v2085_v43 = vld [vmem:[#allocation5 + $0x130] ss:$8 sps:$4 sm:$0xff]   ;;  %v2087_v45 = vld [vmem:[#allocation5 + $0x140] ss:$8 sps:$4 sm:$0xff]   ;;  %p2293_p13 = por %p2292_p12, %p2291_p11 }
  0x49   :  { %1882 = vmatpush3.bf16.msra.mxu1 %v2081_v39  ;;  %v2088_v46 = vld [vmem:[#allocation5 + $0x1d0] ss:$8 sps:$4 sm:$0xff]   ;;  %v2090_v48 = vld [vmem:[#allocation5 + $0x1e0] ss:$8 sps:$4 sm:$0xff]  }
  0x4a   :  { %266 = vmatpush1.bf16.msra.mxu0 %v2044_v9  ;;  %1883 = vmatprep.subr.bf16.mxu1 %v2082_v40  ;;  %v2089_v47 = vld [vmem:[#allocation5 + $0x150] ss:$8 sps:$4 sm:$0xff]   ;;  %v2091_v49 = vld [vmem:[#allocation5 + $0x160] ss:$8 sps:$4 sm:$0xff]   ;;  %p2294_p0 = pnand %p2293_p13, %p2287_p10 }
  0x4b   :  { %267 = vmatprep.subr.bf16.mxu0 %v2045_v10  ;;  %v2092_v50 = vld [vmem:[#allocation5 + $0x1f0] ss:$8 sps:$4 sm:$0xff]  }
  0x4c   :  { %v2093_v51 = vld [vmem:[#allocation5 + $0x170] ss:$8 sps:$4 sm:$0xff]  }
  0x4d   :  { %1884 = vmatpush3.bf16.msra.mxu1 %v2083_v41 }
  0x4e   :  { %268 = vmatpush1.bf16.msra.mxu0 %v2047_v11  ;;  %1885 = vmatprep.subr.bf16.mxu1 %v2084_v42 }
  0x4f   :  { %269 = vmatprep.subr.bf16.mxu0 %v2048_v12 }
  0x51   :  { %1886 = vmatpush3.bf16.msra.mxu1 %v2085_v43 }
  0x52   :  { %270 = vmatpush1.bf16.msra.mxu0 %v2050_v13  ;;  %1887 = vmatprep.subr.bf16.mxu1 %v2086_v44 }
  0x53   :  { %271 = vmatprep.subr.bf16.mxu0 %v2051_v15 }
  0x55   :  { %1888 = vmatpush3.bf16.msra.mxu1 %v2087_v45 }
  0x56   :  { %272 = vmatpush1.bf16.msra.mxu0 %v2053_v17  ;;  %1889 = vmatprep.subr.bf16.mxu1 %v2088_v46 }
  0x57   :  { %273 = vmatprep.subr.bf16.mxu0 %v2054_v18 }
  0x59   :  { %1890 = vmatpush3.bf16.msra.mxu1 %v2089_v47 }
  0x5a   :  { %274 = vmatpush1.bf16.msra.mxu0 %v2056_v19  ;;  %1891 = vmatprep.subr.bf16.mxu1 %v2090_v48 }
  0x5b   :  { %275 = vmatprep.subr.bf16.mxu0 %v2057_v20 }
  0x5d   :  { %1892 = vmatpush3.bf16.msra.mxu1 %v2091_v49  ;;  %v94_v49 = vld [vmem:[#allocation7 + $0x1] ss:$8 sm:$0x3] }
  0x5e   :  { %276 = vmatpush1.bf16.msra.mxu0 %v2059_v21  ;;  %1893 = vmatprep.subr.bf16.mxu1 %v2092_v50 }
  0x5f   :  { %277 = vmatprep.subr.bf16.mxu0 %v2060_v22 }
  0x61   :  { %1894 = vmatpush3.bf16.msra.mxu1 %v2093_v51 }
  0x62   :  { %278 = vmatpush1.bf16.msra.mxu0 %v2062_v23 }
  0x63   :  { %279 = vmatprep.subr.bf16.mxu0 %v2063_v24 }
  0x66   :  { %280 = vmatpush1.bf16.msra.mxu0 %v2065_v25  ;;  %v340_v25 = vlaneseq }
  0x67   :  { %281 = vmatprep.subr.bf16.mxu0 %v2066_v26 }
  0x6a   :  { %282 = vmatpush1.bf16.msra.mxu0 %v2068_v27 }
  0x6b   :  { %283 = vmatprep.subr.bf16.mxu0 %v2069_v28 }
  0x6e   :  { %284 = vmatpush1.bf16.msra.mxu0 %v2071_v29 }
  0x6f   :  { %285 = vmatprep.subr.bf16.mxu0 %v2072_v30  ;;  %v341_v30 = vshrl.u32 %v340_v25, 7 }
  0x71   :  { %v2426_v34 = vsub.s32 1, %v341_v30 }
  0x72   :  { %286 = vmatpush1.bf16.msra.mxu0 %v2074_v31 }
  0x73   :  { %287 = vmatprep.subr.bf16.mxu0 %v2075_v32  ;;  %v2424_v32 = vsub.s32 0, %v341_v30 }
  0x76   :  { %288 = vmatpush1.bf16.msra.mxu0 %v2077_v33  ;;  %v92_v33 = vld [vmem:[#allocation7] ss:$8 sm:$0x3] }
  0x77   :  { %v343_v37 = vrot.slane %v92_v33, %v2424_v32  ;;  %v347_v38 = vrot.slane %v92_v33, %v2426_v34 }
  0x79   :  { %290 = vmatmul.mubr.bf16.vlgmr.msra.gmra.mrb[0].mxu0 %v95_v35  ;;  %v2345_v35 = vmov 1966171168  }
  0x7a   :  { %v358_v36 = vunpack.c.l.s4 %v2345_v35 }
  0x7c   :  { %v359_v40 = vunpack.c.0.s8 %v358_v36 }
  0x7e   :  { %v2430_v46 = vsub.s32 %v359_v40, %v341_v30  ;;  %v433_v40 = vld [vmem:[#allocation7 + $0x3] ss:$0 sm:$0xff] }
 0x14c   :  { %v2412_v52 = vpop.f32.mrb[0].mxu0 }
 0x14d   :  { %v298_v53 = vrot.slane %v2412_v52, 4  ;;  %v313_v54 = vmul.f32 %v2412_v52, %v2412_v52  ;;  %v2417_v55 = vpop.f32.mrb[1].mxu0 }
 0x14e   :  { %v304_v56 = vrot.slane %v2417_v55, 4  ;;  %v314_v57 = vmul.f32 %v2417_v55, %v2417_v55  ;;  %v295_v58 = vpop.f32.mrb[2].mxu0 }
 0x14f   :  { %v299_v59 = vadd.f32 %v298_v53, %v2412_v52  ;;  %v315_v60 = vrot.slane %v313_v54, 4  ;;  %v296_v61 = vpop.f32.mrb[3].mxu0 }
 0x150   :  { %v305_v62 = vadd.f32 %v304_v56, %v2417_v55  ;;  %v321_v63 = vrot.slane %v314_v57, 4 }
 0x151   :  { %v300_v0 = vrot.slane %v299_v59, 2  ;;  %v316_v1 = vadd.f32 %v315_v60, %v313_v54 }
 0x152   :  { %v306_v2 = vrot.slane %v305_v62, 2  ;;  %v322_v3 = vadd.f32 %v321_v63, %v314_v57 }
 0x153   :  { %v301_v4 = vadd.f32 %v300_v0, %v299_v59  ;;  %v317_v5 = vrot.slane %v316_v1, 2 }
 0x154   :  { %v307_v6 = vadd.f32 %v306_v2, %v305_v62  ;;  %v323_v7 = vrot.slane %v322_v3, 2 }
 0x155   :  { %v302_v8 = vrot.slane %v301_v4, 1  ;;  %v318_v9 = vadd.f32 %v317_v5, %v316_v1  ;;  %v2346_v5 = vmov 0.0  }
 0x156   :  { %v308_v10 = vrot.slane %v307_v6, 1  ;;  %v324_v11 = vadd.f32 %v323_v7, %v322_v3  ;;  %1937 = vmatprep.subr.bf16.mxu1 %v2346_v5  ;;  %1997 = vmatprep.subr.bf16.mxu0 %v2346_v5  ;;  %v2098_v7 = vld [vmem:[#allocation5 + $0x240] ss:$8 sps:$4 sm:$0xff]  }
 0x157   :  { %v303_v12 = vadd.f32 %v302_v8, %v301_v4  ;;  %v319_v13 = vrot.slane %v318_v9, 1  ;;  %v2094_v4 = vld [vmem:[#allocation5 + $0x200] ss:$8 sps:$4 sm:$0xff]   ;;  %v2099_v8 = vld [vmem:[#allocation5 + $0x250] ss:$8 sps:$4 sm:$0xff]   ;;  %2013 = vmatprep.mubr.msk.bf16.mxu0 %vm2347_vm0, %v2346_v5 }
 0x158   :  { %v309_v14 = vadd.f32 %v308_v10, %v307_v6  ;;  %v325_v15 = vrot.slane %v324_v11, 1  ;;  %v2097_v6 = vld [vmem:[#allocation5 + $0x230] ss:$8 sps:$4 sm:$0xff]  }
 0x159   :  { %v311_v16 = vmul.f32 0.125, %v303_v12  ;;  %v320_v17 = vadd.f32 %v319_v13, %v318_v9  ;;  %v2100_v9 = vld [vmem:[#allocation5 + $0x260] ss:$8 sps:$4 sm:$0xff]   ;;  %v2101_v10 = vld [vmem:[#allocation5 + $0x270] ss:$8 sps:$4 sm:$0xff]  }
 0x15a   :  { %v312_v18 = vmul.f32 0.125, %v309_v14  ;;  %v326_v19 = vadd.f32 %v325_v15, %v324_v11 }
 0x15b   :  { %v327_v20 = vmul.f32 0.125, %v320_v17  ;;  %v329_v21 = vmul.f32 %v311_v16, %v311_v16 }
 0x15c   :  { %v328_v22 = vmul.f32 0.125, %v326_v19  ;;  %v330_v23 = vmul.f32 %v312_v18, %v312_v18 }
 0x15d   :  { %v331_v24 = vsub.f32 %v327_v20, %v329_v21 }
 0x15e   :  { %v332_v26 = vsub.f32 %v328_v22, %v330_v23 }
 0x15f   :  { %v333_v27 = vmax.f32 %v331_v24, 0.0 }
 0x160   :  { %v334_v28 = vmax.f32 %v332_v26, 0.0 }
 0x161   :  { %v335_v29 = vadd.f32 1e-05, %v333_v27 }
 0x162   :  { %v336_v31 = vadd.f32 1e-05, %v334_v28 }
 0x163   :  { %2198 = vrsqrt.f32 %v335_v29 }
 0x164   :  { %2200 = vrsqrt.f32 %v336_v31 }
 0x16d   :  { %v2199_v39 = vpop.eup %2198 }
 0x16e   :  { %v2201_v41 = vpop.eup %2200  ;;  %v350_v42 = vmul.f32 %v2199_v39, %v343_v37  ;;  %v432_v37 = vld [vmem:[#allocation7 + $0x2] ss:$0 sm:$0xff] }
 0x16f   :  { %v351_v43 = vmul.f32 %v2201_v41, %v347_v38 }
 0x170   :  { %v352_v44 = vmul.f32 %v350_v42, %v311_v16  ;;  %v376_v50 = vrot.slane %v350_v42, %v2424_v32 }
 0x171   :  { %v353_v45 = vmul.f32 %v351_v43, %v312_v18  ;;  %v380_v53 = vrot.slane %v351_v43, %v2424_v32 }
 0x172   :  { %v381_v56 = vmul.f32 %v376_v50, %v2412_v52  ;;  %v2095_v52 = vld [vmem:[#allocation5 + $0x210] ss:$8 sps:$4 sm:$0xff]  }
 0x173   :  { %v356_v47 = vcombine.low %v352_v44, %v353_v45  ;;  %v382_v57 = vmul.f32 %v380_v53, %v2417_v55  ;;  %v2096_v55 = vld [vmem:[#allocation5 + $0x220] ss:$8 sps:$4 sm:$0xff]   ;;  %v2103_v50 = vld [vmem:[#allocation5 + $0x290] ss:$8 sps:$4 sm:$0xff]  }
 0x174   :  { %v2105_v53 = vld [vmem:[#allocation5 + $0x2b0] ss:$8 sps:$4 sm:$0xff]  }
 0x175   :  { %v363_v48 = vrot.slane %v356_v47, %v2430_v46 }
 0x177   :  { %v370_v51 = vrot.slane %v363_v48, %v2430_v46 }
 0x179   :  { %v372_v54 = vsub.f32 %v94_v49, %v370_v51  ;;  %v2102_v49 = vld [vmem:[#allocation5 + $0x280] ss:$8 sps:$4 sm:$0xff]  }
 0x17a   :  { %v2104_v51 = vld [vmem:[#allocation5 + $0x2a0] ss:$8 sps:$4 sm:$0xff]  }
 0x17b   :  { %v391_v58 = vrot.slane %v372_v54, %v2426_v34  ;;  %v387_v59 = vrot.slane %v372_v54, %v2424_v32  ;;  %v2106_v54 = vld [vmem:[#allocation5 + $0x2c0] ss:$8 sps:$4 sm:$0xff]  }
 0x17d   :  { %v395_v60 = vadd.f32 %v391_v58, %v382_v57  ;;  %v394_v61 = vadd.f32 %v387_v59, %v381_v56  ;;  %v2107_v56 = vld [vmem:[#allocation5 + $0x2d0] ss:$8 sps:$4 sm:$0xff]   ;;  %v2108_v57 = vld [vmem:[#allocation5 + $0x2e0] ss:$8 sps:$4 sm:$0xff]  }
 0x17e   :  { %v2109_v58 = vld [vmem:[#allocation5 + $0x2f0] ss:$8 sps:$4 sm:$0xff]  }
 0x17f   :  { %v397_v62 = vmul.f32 0.01, %v395_v60  ;;  %v396_v63 = vmul.f32 0.01, %v394_v61 }
 0x181   :  { %v399_v0 = vmax.f32 %v395_v60, %v397_v62  ;;  %v398_v1 = vmax.f32 %v394_v61, %v396_v63 }
 0x183   :  { %v435_v2 = vpack.c.bf16 %v399_v0, %v399_v0  ;;  %v434_v3 = vpack.c.bf16 %v398_v1, %v398_v1 }
 0x185   :  { %564 = vmatprep.mubr.bf16.mxu1 %v435_v2 }
 0x186   :  { %565 = vmatmul.mubr.bf16.vlgmr.msra.gmra.mrb[0].mxu1 %v434_v3 }
 0x187   :  { %1938 = vmatpush3.bf16.msra.mxu1 %v2094_v4  ;;  %1953 = vmatprep.mubr.msk.bf16.mxu1 %vm2347_vm0, %v2346_v5 }
 0x188   :  { %1939 = vmatprep.subr.bf16.mxu1 %v2346_v5 }
 0x18b   :  { %1940 = vmatpush3.bf16.msra.mxu1 %v2095_v52 }
 0x18c   :  { %1941 = vmatprep.subr.bf16.mxu1 %v2346_v5 }
 0x18f   :  { %1942 = vmatpush3.bf16.msra.mxu1 %v2096_v55 }
 0x190   :  { %1943 = vmatprep.subr.bf16.mxu1 %v2346_v5 }
 0x193   :  { %1944 = vmatpush3.bf16.msra.mxu1 %v2097_v6 }
 0x194   :  { %1945 = vmatprep.subr.bf16.mxu1 %v2346_v5 }
 0x197   :  { %1946 = vmatpush3.bf16.msra.mxu1 %v2098_v7 }
 0x198   :  { %1947 = vmatprep.subr.bf16.mxu1 %v2346_v5 }
 0x19b   :  { %1948 = vmatpush3.bf16.msra.mxu1 %v2099_v8 }
 0x19c   :  { %1949 = vmatprep.subr.bf16.mxu1 %v2346_v5 }
 0x19f   :  { %1950 = vmatpush3.bf16.msra.mxu1 %v2100_v9 }
 0x1a0   :  { %1951 = vmatprep.subr.bf16.mxu1 %v2346_v5 }
 0x1a3   :  { %1952 = vmatpush3.bf16.msra.mxu1 %v2101_v10 }
 0x1a4   :  { %1957 = vmatprep.subr.bf16.mxu1 %v2346_v5 }
 0x259   :  { %v1895_v11 = vpop.f32.mrb[0].mxu1 }
 0x25a   :  { %v1896_v12 = vpop.f32.mrb[1].mxu1 }
 0x25b   :  { %v1897_v13 = vadd.f32 %v1896_v12, %v1895_v11  ;;  %v1898_v14 = vpop.f32.mrb[2].mxu1 }
 0x25c   :  { %v1899_v15 = vpop.f32.mrb[3].mxu1 }
 0x25d   :  { %v572_v16 = vrot.slane %v1897_v13, 4  ;;  %v579_v17 = vmul.f32 %v1897_v13, %v1897_v13 }
 0x25f   :  { %v573_v18 = vadd.f32 %v1897_v13, %v572_v16  ;;  %v580_v19 = vrot.slane %v579_v17, 4 }
 0x261   :  { %v574_v20 = vrot.slane %v573_v18, 2  ;;  %v581_v21 = vadd.f32 %v580_v19, %v579_v17  ;;  %v615_v17 = vld [vmem:[#allocation7 + $0x4] ss:$0 sm:$0xff] }
 0x263   :  { %v575_v22 = vadd.f32 %v574_v20, %v573_v18  ;;  %v582_v23 = vrot.slane %v581_v21, 2  ;;  %v616_v20 = vld [vmem:[#allocation7 + $0x5] ss:$0 sm:$0xff] }
 0x265   :  { %v576_v24 = vrot.slane %v575_v22, 1  ;;  %v583_v25 = vadd.f32 %v582_v23, %v581_v21 }
 0x267   :  { %v577_v26 = vadd.f32 %v576_v24, %v575_v22  ;;  %v584_v27 = vrot.slane %v583_v25, 1 }
 0x269   :  { %v578_v28 = vmul.f32 0.125, %v577_v26  ;;  %v585_v29 = vadd.f32 %v584_v27, %v583_v25 }
 0x26b   :  { %v586_v30 = vmul.f32 0.125, %v585_v29  ;;  %v587_v31 = vmul.f32 %v578_v28, %v578_v28  ;;  %v2111_v29 = vld [vmem:[#allocation5 + $0x310] ss:$8 sps:$4 sm:$0xff]  }
 0x26d   :  { %v588_v33 = vsub.f32 %v586_v30, %v587_v31  ;;  %v2112_v30 = vld [vmem:[#allocation5 + $0x320] ss:$8 sps:$4 sm:$0xff]   ;;  %v2113_v31 = vld [vmem:[#allocation5 + $0x330] ss:$8 sps:$4 sm:$0xff]  }
 0x26f   :  { %v589_v35 = vmax.f32 %v588_v33, 0.0  ;;  %v2114_v33 = vld [vmem:[#allocation5 + $0x340] ss:$8 sps:$4 sm:$0xff]  }
 0x271   :  { %v590_v36 = vadd.f32 1e-05, %v589_v35  ;;  %v2115_v35 = vld [vmem:[#allocation5 + $0x350] ss:$8 sps:$4 sm:$0xff]  }
 0x273   :  { %2202 = vrsqrt.f32 %v590_v36  ;;  %v2116_v36 = vld [vmem:[#allocation5 + $0x360] ss:$8 sps:$4 sm:$0xff]  }
 0x27d   :  { %v2203_v38 = vpop.eup %2202 }
 0x27e   :  { %v592_v39 = vmul.f32 %v2203_v38, %v432_v37  ;;  %v2117_v37 = vld [vmem:[#allocation5 + $0x370] ss:$8 sps:$4 sm:$0xff]  }
 0x280   :  { %v593_v41 = vmul.f32 %v592_v39, %v578_v28  ;;  %v595_v42 = vmul.f32 %v1897_v13, %v592_v39  ;;  %v2110_v28 = vld [vmem:[#allocation5 + $0x300] ss:$8 sps:$4 sm:$0xff]  }
 0x282   :  { %v594_v43 = vsub.f32 %v433_v40, %v593_v41 }
 0x284   :  { %v596_v44 = vadd.f32 %v595_v42, %v594_v43 }
 0x286   :  { %v597_v45 = vmul.f32 0.01, %v596_v44 }
 0x288   :  { %v598_v47 = vmax.f32 %v596_v44, %v597_v45 }
 0x28a   :  { %v617_v48 = vpack.c.bf16 %v598_v47, %v598_v47 }
 0x28c   :  { %1954 = vmatmul.mubr.bf16.vlgmr.msra.gmra.mrb[4].mxu1 %v617_v48 }
 0x28d   :  { %1973 = vmatprep.mubr.msk.bf16.mxu1 %vm2347_vm0, %v2346_v5  ;;  %1958 = vmatpush3.bf16.msra.mxu1 %v2102_v49 }
 0x28e   :  { %1959 = vmatprep.subr.bf16.mxu1 %v2346_v5 }
 0x291   :  { %1960 = vmatpush3.bf16.msra.mxu1 %v2103_v50 }
 0x292   :  { %1961 = vmatprep.subr.bf16.mxu1 %v2346_v5 }
 0x295   :  { %1962 = vmatpush3.bf16.msra.mxu1 %v2104_v51 }
 0x296   :  { %1963 = vmatprep.subr.bf16.mxu1 %v2346_v5 }
 0x299   :  { %1964 = vmatpush3.bf16.msra.mxu1 %v2105_v53 }
 0x29a   :  { %1965 = vmatprep.subr.bf16.mxu1 %v2346_v5 }
 0x29d   :  { %1966 = vmatpush3.bf16.msra.mxu1 %v2106_v54 }
 0x29e   :  { %1967 = vmatprep.subr.bf16.mxu1 %v2346_v5 }
 0x2a1   :  { %1968 = vmatpush3.bf16.msra.mxu1 %v2107_v56 }
 0x2a2   :  { %1969 = vmatprep.subr.bf16.mxu1 %v2346_v5 }
 0x2a5   :  { %1970 = vmatpush3.bf16.msra.mxu1 %v2108_v57 }
 0x2a6   :  { %1971 = vmatprep.subr.bf16.mxu1 %v2346_v5 }
 0x2a9   :  { %1972 = vmatpush3.bf16.msra.mxu1 %v2109_v58 }
 0x2aa   :  { %1977 = vmatprep.subr.bf16.mxu1 %v2346_v5 }
 0x35f   :  { %v700_v59 = vpop.f32.mrb[4].mxu1 }
 0x360   :  { %v706_v60 = vrot.slane %v700_v59, 4  ;;  %v713_v61 = vmul.f32 %v700_v59, %v700_v59  ;;  %v1955_v62 = vpop.f32.mrb[5].mxu1 }
 0x361   :  { %v703_v63 = vpop.f32.mrb[6].mxu1 }
 0x362   :  { %v707_v0 = vadd.f32 %v706_v60, %v700_v59  ;;  %v714_v1 = vrot.slane %v713_v61, 4  ;;  %v1956_v2 = vpop.f32.mrb[7].mxu1 }
 0x364   :  { %v708_v3 = vrot.slane %v707_v0, 2  ;;  %v715_v4 = vadd.f32 %v714_v1, %v713_v61 }
 0x366   :  { %v709_v52 = vadd.f32 %v708_v3, %v707_v0  ;;  %v716_v55 = vrot.slane %v715_v4, 2  ;;  %v749_v0 = vld [vmem:[#allocation7 + $0x6] ss:$0 sm:$0xff]  ;;  %v750_v3 = vld [vmem:[#allocation7 + $0x7] ss:$0 sm:$0xff] }
 0x368   :  { %v710_v6 = vrot.slane %v709_v52, 1  ;;  %v717_v7 = vadd.f32 %v716_v55, %v715_v4 }
 0x36a   :  { %v711_v8 = vadd.f32 %v710_v6, %v709_v52  ;;  %v718_v9 = vrot.slane %v717_v7, 1 }
 0x36c   :  { %v712_v10 = vmul.f32 0.125, %v711_v8  ;;  %v719_v11 = vadd.f32 %v718_v9, %v717_v7 }
 0x36e   :  { %v720_v12 = vmul.f32 0.125, %v719_v11  ;;  %v721_v13 = vmul.f32 %v712_v10, %v712_v10  ;;  %v2119_v11 = vld [vmem:[#allocation5 + $0x390] ss:$8 sps:$4 sm:$0xff]  }
 0x370   :  { %v722_v14 = vsub.f32 %v720_v12, %v721_v13  ;;  %v2120_v12 = vld [vmem:[#allocation5 + $0x3a0] ss:$8 sps:$4 sm:$0xff]   ;;  %v2121_v13 = vld [vmem:[#allocation5 + $0x3b0] ss:$8 sps:$4 sm:$0xff]  }
 0x372   :  { %v723_v15 = vmax.f32 %v722_v14, 0.0  ;;  %v2122_v14 = vld [vmem:[#allocation5 + $0x3c0] ss:$8 sps:$4 sm:$0xff]  }
 0x374   :  { %v724_v16 = vadd.f32 1e-05, %v723_v15  ;;  %v2123_v15 = vld [vmem:[#allocation5 + $0x3d0] ss:$8 sps:$4 sm:$0xff]  }
 0x376   :  { %2204 = vrsqrt.f32 %v724_v16  ;;  %v2124_v16 = vld [vmem:[#allocation5 + $0x3e0] ss:$8 sps:$4 sm:$0xff]  }
 0x380   :  { %v2205_v18 = vpop.eup %2204 }
 0x381   :  { %v726_v19 = vmul.f32 %v2205_v18, %v615_v17  ;;  %v2125_v17 = vld [vmem:[#allocation5 + $0x3f0] ss:$8 sps:$4 sm:$0xff]  }
 0x383   :  { %v727_v21 = vmul.f32 %v726_v19, %v712_v10  ;;  %v729_v23 = vmul.f32 %v726_v19, %v700_v59  ;;  %v2118_v10 = vld [vmem:[#allocation5 + $0x380] ss:$8 sps:$4 sm:$0xff]  }
 0x384   :  { %1998 = vmatpush3.bf16.msra.mxu0 %v2118_v10  ;;  %v2155_v10 = vld [vmem:[#allocation5 + $0x494] ss:$8 sps:$4 sm:$0xff]  }
 0x385   :  { %v728_v22 = vsub.f32 %v616_v20, %v727_v21  ;;  %1999 = vmatprep.subr.bf16.mxu0 %v2346_v5 }
 0x387   :  { %v730_v24 = vadd.f32 %v729_v23, %v728_v22 }
 0x388   :  { %2000 = vmatpush3.bf16.msra.mxu0 %v2119_v11  ;;  %v2153_v11 = vld [vmem:[#allocation5 + $0x490] ss:$8 sps:$4 sm:$0xff]  }
 0x389   :  { %v731_v25 = vmul.f32 0.01, %v730_v24  ;;  %2001 = vmatprep.subr.bf16.mxu0 %v2346_v5 }
 0x38b   :  { %v732_v26 = vmax.f32 %v730_v24, %v731_v25 }
 0x38c   :  { %2002 = vmatpush3.bf16.msra.mxu0 %v2120_v12 }
 0x38d   :  { %v751_v27 = vpack.c.bf16 %v732_v26, %v732_v26  ;;  %2003 = vmatprep.subr.bf16.mxu0 %v2346_v5 }
 0x38f   :  { %1974 = vmatmul.mubr.bf16.vlgmr.msra.gmra.mrb[8].mxu1 %v751_v27 }
 0x390   :  { %1993 = vmatprep.mubr.msk.bf16.mxu1 %vm2347_vm0, %v2346_v5  ;;  %1978 = vmatpush3.bf16.msra.mxu1 %v2110_v28 }
 0x391   :  { %1979 = vmatprep.subr.bf16.mxu1 %v2346_v5  ;;  %2004 = vmatpush3.bf16.msra.mxu0 %v2121_v13 }
 0x392   :  { %2005 = vmatprep.subr.bf16.mxu0 %v2346_v5 }
 0x394   :  { %1980 = vmatpush3.bf16.msra.mxu1 %v2111_v29 }
 0x395   :  { %1981 = vmatprep.subr.bf16.mxu1 %v2346_v5  ;;  %2006 = vmatpush3.bf16.msra.mxu0 %v2122_v14 }
 0x396   :  { %2007 = vmatprep.subr.bf16.mxu0 %v2346_v5 }
 0x398   :  { %1982 = vmatpush3.bf16.msra.mxu1 %v2112_v30 }
 0x399   :  { %1983 = vmatprep.subr.bf16.mxu1 %v2346_v5  ;;  %2008 = vmatpush3.bf16.msra.mxu0 %v2123_v15 }
 0x39a   :  { %2009 = vmatprep.subr.bf16.mxu0 %v2346_v5 }
 0x39c   :  { %1984 = vmatpush3.bf16.msra.mxu1 %v2113_v31 }
 0x39d   :  { %1985 = vmatprep.subr.bf16.mxu1 %v2346_v5  ;;  %2010 = vmatpush3.bf16.msra.mxu0 %v2124_v16 }
 0x39e   :  { %2011 = vmatprep.subr.bf16.mxu0 %v2346_v5 }
 0x3a0   :  { %1986 = vmatpush3.bf16.msra.mxu1 %v2114_v33 }
 0x3a1   :  { %1987 = vmatprep.subr.bf16.mxu1 %v2346_v5  ;;  %2012 = vmatpush3.bf16.msra.mxu0 %v2125_v17 }
 0x3a4   :  { %1988 = vmatpush3.bf16.msra.mxu1 %v2115_v35 }
 0x3a5   :  { %1989 = vmatprep.subr.bf16.mxu1 %v2346_v5 }
 0x3a8   :  { %1990 = vmatpush3.bf16.msra.mxu1 %v2116_v36 }
 0x3a9   :  { %1991 = vmatprep.subr.bf16.mxu1 %v2346_v5 }
 0x3ac   :  { %1992 = vmatpush3.bf16.msra.mxu1 %v2117_v37 }
 0x462   :  { %v834_v38 = vpop.f32.mrb[8].mxu1 }
 0x463   :  { %v840_v39 = vrot.slane %v834_v38, 4  ;;  %v847_v40 = vmul.f32 %v834_v38, %v834_v38  ;;  %v1975_v41 = vpop.f32.mrb[9].mxu1 }
 0x464   :  { %v837_v42 = vpop.f32.mrb[10].mxu1 }
 0x465   :  { %v841_v43 = vadd.f32 %v840_v39, %v834_v38  ;;  %v848_v44 = vrot.slane %v847_v40, 4  ;;  %v1976_v45 = vpop.f32.mrb[11].mxu1  ;;  %v884_v42 = vld [vmem:[#allocation7 + $0x10] ss:$0 sm:$0xff] }
 0x466   :  { %v885_v45 = vld [vmem:[#allocation7 + $0x11] ss:$0 sm:$0xff] }
 0x467   :  { %v842_v47 = vrot.slane %v841_v43, 2  ;;  %v849_v48 = vadd.f32 %v848_v44, %v847_v40 }
 0x469   :  { %v843_v49 = vadd.f32 %v842_v47, %v841_v43  ;;  %v850_v50 = vrot.slane %v849_v48, 2 }
 0x46b   :  { %v844_v51 = vrot.slane %v843_v49, 1  ;;  %v851_v53 = vadd.f32 %v850_v50, %v849_v48 }
 0x46d   :  { %v845_v54 = vadd.f32 %v844_v51, %v843_v49  ;;  %v852_v56 = vrot.slane %v851_v53, 1 }
 0x46f   :  { %v846_v57 = vmul.f32 0.125, %v845_v54  ;;  %v853_v58 = vadd.f32 %v852_v56, %v851_v53  ;;  %v2128_v56 = vld [vmem:[#allocation5 + $0x404] ss:$8 sps:$4 sm:$0xff]  }
 0x470   :  { %1237 = vmatprep.subr.bf16.mxu1 %v2128_v56  ;;  %v2167_v56 = vld [vmem:[#allocation5 + $0x4d4] ss:$8 sps:$4 sm:$0xff]  }
 0x471   :  { %v854_v59 = vmul.f32 0.125, %v853_v58  ;;  %v855_v60 = vmul.f32 %v846_v57, %v846_v57  ;;  %v2131_v58 = vld [vmem:[#allocation5 + $0x414] ss:$8 sps:$4 sm:$0xff]  }
 0x473   :  { %v856_v61 = vsub.f32 %v854_v59, %v855_v60  ;;  %v2129_v59 = vld [vmem:[#allocation5 + $0x410] ss:$8 sps:$4 sm:$0xff]   ;;  %v2134_v60 = vld [vmem:[#allocation5 + $0x424] ss:$8 sps:$4 sm:$0xff]  }
 0x475   :  { %v857_v62 = vmax.f32 %v856_v61, 0.0  ;;  %v2132_v61 = vld [vmem:[#allocation5 + $0x420] ss:$8 sps:$4 sm:$0xff]  }
 0x477   :  { %v858_v63 = vadd.f32 1e-05, %v857_v62  ;;  %v2137_v62 = vld [vmem:[#allocation5 + $0x434] ss:$8 sps:$4 sm:$0xff]  }
 0x479   :  { %2206 = vrsqrt.f32 %v858_v63  ;;  %v2135_v63 = vld [vmem:[#allocation5 + $0x430] ss:$8 sps:$4 sm:$0xff]  }
 0x483   :  { %v2207_v1 = vpop.eup %2206 }
 0x484   :  { %v860_v2 = vmul.f32 %v2207_v1, %v749_v0  ;;  %v2140_v0 = vld [vmem:[#allocation5 + $0x444] ss:$8 sps:$4 sm:$0xff]   ;;  %v2138_v1 = vld [vmem:[#allocation5 + $0x440] ss:$8 sps:$4 sm:$0xff]  }
 0x486   :  { %v861_v4 = vmul.f32 %v860_v2, %v846_v57  ;;  %v863_v55 = vmul.f32 %v860_v2, %v834_v38  ;;  %v2126_v57 = vld [vmem:[#allocation5 + $0x400] ss:$8 sps:$4 sm:$0xff]   ;;  %v2143_v2 = vld [vmem:[#allocation5 + $0x454] ss:$8 sps:$4 sm:$0xff]  }
 0x488   :  { %v862_v52 = vsub.f32 %v750_v3, %v861_v4  ;;  %v2141_v3 = vld [vmem:[#allocation5 + $0x450] ss:$8 sps:$4 sm:$0xff]   ;;  %v2146_v4 = vld [vmem:[#allocation5 + $0x464] ss:$8 sps:$4 sm:$0xff]  }
 0x48a   :  { %v864_v6 = vadd.f32 %v863_v55, %v862_v52  ;;  %v2144_v52 = vld [vmem:[#allocation5 + $0x460] ss:$8 sps:$4 sm:$0xff]   ;;  %v2147_v55 = vld [vmem:[#allocation5 + $0x470] ss:$8 sps:$4 sm:$0xff]  }
 0x48c   :  { %v865_v7 = vmul.f32 0.01, %v864_v6 }
 0x48e   :  { %v866_v8 = vmax.f32 %v864_v6, %v865_v7  ;;  %v2149_v6 = vld [vmem:[#allocation5 + $0x474] ss:$8 sps:$4 sm:$0xff]   ;;  %v2348_v7 = vmov 0  }
 0x490   :  { %v886_v9 = vpack.c.bf16 %v866_v8, %v866_v8  ;;  %867 = vst [vmem:[#allocation9] sm:$0xff] %v866_v8  ;;  %v2150_v8 = vld [vmem:[#allocation5 + $0x480] ss:$8 sps:$4 sm:$0xff]  }
 0x492   :  { %1994 = vmatmul.mubr.bf16.vlgmr.msra.gmra.mrb[12].mxu1 %v886_v9  ;;  %v2152_v9 = vld [vmem:[#allocation5 + $0x484] ss:$8 sps:$4 sm:$0xff]  }
 0x493   :  { %1238 = vmatpush1.bf16.msra.mxu1 %v2126_v57  ;;  %1269 = vmatprep.mubr.bf16.mxu1 %v2348_v7  ;;  %v2165_v57 = vld [vmem:[#allocation5 + $0x4d0] ss:$8 sps:$4 sm:$0xff]   ;;  %v2191_v7 = vld [vmem:[#allocation5 + $0x554] ss:$8 sps:$4 sm:$0xff]  }
 0x494   :  { %1239 = vmatprep.subr.bf16.mxu1 %v2131_v58  ;;  %1577 = vmatprep.subr.bf16.mxu0 %v2152_v9  ;;  %v2170_v58 = vld [vmem:[#allocation5 + $0x4e4] ss:$8 sps:$4 sm:$0xff]  }
 0x495   :  { %v2194_v9 = vld [vmem:[#allocation5 + $0x564] ss:$8 sps:$4 sm:$0xff]  }
 0x497   :  { %1240 = vmatpush1.bf16.msra.mxu1 %v2129_v59  ;;  %v2168_v59 = vld [vmem:[#allocation5 + $0x4e0] ss:$8 sps:$4 sm:$0xff]  }
 0x498   :  { %1241 = vmatprep.subr.bf16.mxu1 %v2134_v60  ;;  %v2173_v60 = vld [vmem:[#allocation5 + $0x4f4] ss:$8 sps:$4 sm:$0xff]  }
 0x49b   :  { %1242 = vmatpush1.bf16.msra.mxu1 %v2132_v61  ;;  %v2171_v61 = vld [vmem:[#allocation5 + $0x4f0] ss:$8 sps:$4 sm:$0xff]  }
 0x49c   :  { %1243 = vmatprep.subr.bf16.mxu1 %v2137_v62  ;;  %v2176_v62 = vld [vmem:[#allocation5 + $0x504] ss:$8 sps:$4 sm:$0xff]  }
 0x49f   :  { %1244 = vmatpush1.bf16.msra.mxu1 %v2135_v63  ;;  %v2174_v63 = vld [vmem:[#allocation5 + $0x500] ss:$8 sps:$4 sm:$0xff]  }
 0x4a0   :  { %1245 = vmatprep.subr.bf16.mxu1 %v2140_v0  ;;  %v2179_v0 = vld [vmem:[#allocation5 + $0x514] ss:$8 sps:$4 sm:$0xff]  }
 0x4a3   :  { %1246 = vmatpush1.bf16.msra.mxu1 %v2138_v1  ;;  %v2177_v1 = vld [vmem:[#allocation5 + $0x510] ss:$8 sps:$4 sm:$0xff]  }
 0x4a4   :  { %1247 = vmatprep.subr.bf16.mxu1 %v2143_v2  ;;  %v2182_v2 = vld [vmem:[#allocation5 + $0x524] ss:$8 sps:$4 sm:$0xff]  }
 0x4a7   :  { %1248 = vmatpush1.bf16.msra.mxu1 %v2141_v3  ;;  %v2180_v3 = vld [vmem:[#allocation5 + $0x520] ss:$8 sps:$4 sm:$0xff]  }
 0x4a8   :  { %1249 = vmatprep.subr.bf16.mxu1 %v2146_v4  ;;  %v2185_v4 = vld [vmem:[#allocation5 + $0x534] ss:$8 sps:$4 sm:$0xff]  }
 0x4ab   :  { %1250 = vmatpush1.bf16.msra.mxu1 %v2144_v52  ;;  %v2183_v52 = vld [vmem:[#allocation5 + $0x530] ss:$8 sps:$4 sm:$0xff]  }
 0x4ac   :  { %1251 = vmatprep.subr.bf16.mxu1 %v2149_v6  ;;  %v2188_v6 = vld [vmem:[#allocation5 + $0x544] ss:$8 sps:$4 sm:$0xff]  }
 0x4af   :  { %1252 = vmatpush1.bf16.msra.mxu1 %v2147_v55  ;;  %v2186_v55 = vld [vmem:[#allocation5 + $0x540] ss:$8 sps:$4 sm:$0xff]  }
 0x565   :  { %v969_v18 = vpop.f32.mrb[12].mxu1 }
 0x566   :  { %v975_v19 = vrot.slane %v969_v18, 4  ;;  %v982_v20 = vmul.f32 %v969_v18, %v969_v18  ;;  %v1995_v21 = vpop.f32.mrb[13].mxu1 }
 0x567   :  { %v972_v22 = vpop.f32.mrb[14].mxu1 }
 0x568   :  { %v976_v23 = vadd.f32 %v975_v19, %v969_v18  ;;  %v983_v24 = vrot.slane %v982_v20, 4  ;;  %v1996_v25 = vpop.f32.mrb[15].mxu1 }
 0x56a   :  { %v977_v26 = vrot.slane %v976_v23, 2  ;;  %v984_v27 = vadd.f32 %v983_v24, %v982_v20 }
 0x56c   :  { %v978_v28 = vadd.f32 %v977_v26, %v976_v23  ;;  %v985_v29 = vrot.slane %v984_v27, 2 }
 0x56e   :  { %v979_v30 = vrot.slane %v978_v28, 1  ;;  %v986_v31 = vadd.f32 %v985_v29, %v984_v27 }
 0x570   :  { %v980_v33 = vadd.f32 %v979_v30, %v978_v28  ;;  %v987_v35 = vrot.slane %v986_v31, 1 }
 0x572   :  { %v981_v36 = vmul.f32 0.125, %v980_v33  ;;  %v988_v5 = vadd.f32 %v987_v35, %v986_v31 }
 0x574   :  { %v989_v37 = vmul.f32 0.125, %v988_v5  ;;  %v990_v38 = vmul.f32 %v981_v36, %v981_v36  ;;  %v1018_v5 = vld [vmem:[#allocation7 + $0x12] ss:$0 sm:$0xff] }
 0x576   :  { %v991_v39 = vsub.f32 %v989_v37, %v990_v38 }
 0x578   :  { %v992_v40 = vmax.f32 %v991_v39, 0.0  ;;  %v1019_v39 = vld [vmem:[#allocation7 + $0x13] ss:$0 sm:$0xff] }
 0x57a   :  { %v993_v41 = vadd.f32 1e-05, %v992_v40 }
 0x57c   :  { %2208 = vrsqrt.f32 %v993_v41 }
 0x586   :  { %v2209_v43 = vpop.eup %2208 }
 0x587   :  { %v995_v44 = vmul.f32 %v2209_v43, %v884_v42 }
 0x589   :  { %v996_v47 = vmul.f32 %v995_v44, %v981_v36  ;;  %v998_v49 = vmul.f32 %v995_v44, %v969_v18 }
 0x58b   :  { %v997_v48 = vsub.f32 %v885_v45, %v996_v47 }
 0x58d   :  { %v999_v50 = vadd.f32 %v998_v49, %v997_v48  ;;  %v2158_v48 = vld [vmem:[#allocation5 + $0x4a4] ss:$8 sps:$4 sm:$0xff]   ;;  %v2156_v49 = vld [vmem:[#allocation5 + $0x4a0] ss:$8 sps:$4 sm:$0xff]  }
 0x58f   :  { %v1000_v51 = vmul.f32 0.01, %v999_v50 }
 0x591   :  { %v1001_v53 = vmax.f32 %v999_v50, %v1000_v51  ;;  %v2161_v50 = vld [vmem:[#allocation5 + $0x4b4] ss:$8 sps:$4 sm:$0xff]   ;;  %v2159_v51 = vld [vmem:[#allocation5 + $0x4b0] ss:$8 sps:$4 sm:$0xff]  }
 0x593   :  { %v1020_v54 = vpack.c.bf16 %v1001_v53, %v1001_v53  ;;  %v2164_v53 = vld [vmem:[#allocation5 + $0x4c4] ss:$8 sps:$4 sm:$0xff]  }
 0x595   :  { %2014 = vmatmul.mubr.bf16.vlgmr.msra.gmra.mrb[4].mxu0 %v1020_v54  ;;  %v2162_v54 = vld [vmem:[#allocation5 + $0x4c0] ss:$8 sps:$4 sm:$0xff]  }
 0x596   :  { %1578 = vmatpush1.bf16.msra.mxu0 %v2150_v8  ;;  %v2189_v8 = vld [vmem:[#allocation5 + $0x550] ss:$8 sps:$4 sm:$0xff]  }
 0x597   :  { %1579 = vmatprep.subr.bf16.mxu0 %v2155_v10  ;;  %v2192_v10 = vld [vmem:[#allocation5 + $0x560] ss:$8 sps:$4 sm:$0xff]  }
 0x59a   :  { %1580 = vmatpush1.bf16.msra.mxu0 %v2153_v11  ;;  %v2197_v11 = vld [vmem:[#allocation5 + $0x574] ss:$8 sps:$4 sm:$0xff]  }
 0x59b   :  { %1581 = vmatprep.subr.bf16.mxu0 %v2158_v48 }
 0x59e   :  { %1582 = vmatpush1.bf16.msra.mxu0 %v2156_v49 }
 0x59f   :  { %1583 = vmatprep.subr.bf16.mxu0 %v2161_v50 }
 0x5a2   :  { %1584 = vmatpush1.bf16.msra.mxu0 %v2159_v51 }
 0x5a3   :  { %1585 = vmatprep.subr.bf16.mxu0 %v2164_v53 }
 0x5a6   :  { %1586 = vmatpush1.bf16.msra.mxu0 %v2162_v54 }
 0x5a7   :  { %1587 = vmatprep.subr.bf16.mxu0 %v2167_v56 }
 0x5aa   :  { %1588 = vmatpush1.bf16.msra.mxu0 %v2165_v57 }
 0x5ab   :  { %1589 = vmatprep.subr.bf16.mxu0 %v2170_v58 }
 0x5ae   :  { %1590 = vmatpush1.bf16.msra.mxu0 %v2168_v59  ;;  %v1153_v59 = vld [vmem:[#allocation7 + $0x14] ss:$8 sm:$0x3] }
 0x5af   :  { %1591 = vmatprep.subr.bf16.mxu0 %v2173_v60  ;;  %v1322_v60 = vrot.slane %v1153_v59, %v2424_v32 }
 0x5b2   :  { %1592 = vmatpush1.bf16.msra.mxu0 %v2171_v61  ;;  %v1326_v61 = vrot.slane %v1153_v59, %v2426_v34 }
 0x5b3   :  { %1593 = vmatprep.subr.bf16.mxu0 %v2176_v62 }
 0x5b6   :  { %1594 = vmatpush1.bf16.msra.mxu0 %v2174_v63 }
 0x5b7   :  { %1595 = vmatprep.subr.bf16.mxu0 %v2179_v0 }
 0x5ba   :  { %1596 = vmatpush1.bf16.msra.mxu0 %v2177_v1 }
 0x5bb   :  { %1597 = vmatprep.subr.bf16.mxu0 %v2182_v2 }
 0x5be   :  { %1598 = vmatpush1.bf16.msra.mxu0 %v2180_v3 }
 0x5bf   :  { %1599 = vmatprep.subr.bf16.mxu0 %v2185_v4 }
 0x5c2   :  { %1600 = vmatpush1.bf16.msra.mxu0 %v2183_v52 }
 0x5c3   :  { %1601 = vmatprep.subr.bf16.mxu0 %v2188_v6 }
 0x5c6   :  { %1602 = vmatpush1.bf16.msra.mxu0 %v2186_v55  ;;  %v1155_v55 = vld [vmem:[#allocation7 + $0x15] ss:$8 sm:$0x3] }
 0x5c7   :  { %1603 = vmatprep.subr.bf16.mxu0 %v2191_v7 }
 0x5ca   :  { %1604 = vmatpush1.bf16.msra.mxu0 %v2189_v8 }
 0x5cb   :  { %1605 = vmatprep.subr.bf16.mxu0 %v2194_v9 }
 0x5ce   :  { %1606 = vmatpush1.bf16.msra.mxu0 %v2192_v10 }
 0x5cf   :  { %1607 = vmatprep.subr.bf16.mxu0 %v2197_v11 }
 0x668   :  { %v1103_v12 = vpop.f32.mrb[4].mxu0 }
 0x669   :  { %v1109_v13 = vrot.slane %v1103_v12, 4  ;;  %v1116_v14 = vmul.f32 %v1103_v12, %v1103_v12  ;;  %v2015_v15 = vpop.f32.mrb[5].mxu0 }
 0x66a   :  { %v1106_v16 = vpop.f32.mrb[6].mxu0 }
 0x66b   :  { %v1110_v17 = vadd.f32 %v1109_v13, %v1103_v12  ;;  %v1117_v18 = vrot.slane %v1116_v14, 4  ;;  %v2016_v19 = vpop.f32.mrb[7].mxu0 }
 0x66d   :  { %v1111_v20 = vrot.slane %v1110_v17, 2  ;;  %v1118_v21 = vadd.f32 %v1117_v18, %v1116_v14 }
 0x66f   :  { %v1112_v22 = vadd.f32 %v1111_v20, %v1110_v17  ;;  %v1119_v23 = vrot.slane %v1118_v21, 2 }
 0x671   :  { %v1113_v24 = vrot.slane %v1112_v22, 1  ;;  %v1120_v25 = vadd.f32 %v1119_v23, %v1118_v21 }
 0x673   :  { %v1114_v26 = vadd.f32 %v1113_v24, %v1112_v22  ;;  %v1121_v27 = vrot.slane %v1120_v25, 1 }
 0x675   :  { %v1115_v28 = vmul.f32 0.125, %v1114_v26  ;;  %v1122_v29 = vadd.f32 %v1121_v27, %v1120_v25 }
 0x677   :  { %v1123_v30 = vmul.f32 0.125, %v1122_v29  ;;  %v1124_v31 = vmul.f32 %v1115_v28, %v1115_v28 }
 0x679   :  { %v1125_v33 = vsub.f32 %v1123_v30, %v1124_v31 }
 0x67b   :  { %v1126_v35 = vmax.f32 %v1125_v33, 0.0 }
 0x67d   :  { %v1127_v36 = vadd.f32 1e-05, %v1126_v35 }
 0x67f   :  { %2210 = vrsqrt.f32 %v1127_v36 }
 0x689   :  { %v2211_v37 = vpop.eup %2210 }
 0x68a   :  { %v1129_v38 = vmul.f32 %v2211_v37, %v1018_v5 }
 0x68c   :  { %v1130_v40 = vmul.f32 %v1129_v38, %v1115_v28  ;;  %v1132_v42 = vmul.f32 %v1129_v38, %v1103_v12  ;;  %v2195_v12 = vld [vmem:[#allocation5 + $0x570] ss:$8 sps:$4 sm:$0xff]  }
 0x68d   :  { %1608 = vmatpush1.bf16.msra.mxu0 %v2195_v12 }
 0x68e   :  { %v1131_v41 = vsub.f32 %v1019_v39, %v1130_v40 }
 0x690   :  { %v1133_v43 = vadd.f32 %v1132_v42, %v1131_v41 }
 0x692   :  { %v1134_v44 = vmul.f32 0.01, %v1133_v43 }
 0x694   :  { %v1135_v45 = vmax.f32 %v1133_v43, %v1134_v44 }
 0x696   :  { %v1156_v47 = vpack.c.bf16 %v1135_v45, %v1135_v45 }
 0x698   :  { %1270 = vmatmul.mubr.bf16.vlgmr.msra.gmra.mrb[16].mxu1 %v1156_v47 }
 0x76b   :  { %v1271_v13 = vpop.f32.mrb[16].mxu1 }
 0x76c   :  { %v1278_v14 = vrot.slane %v1271_v13, 4  ;;  %v1292_v15 = vmul.f32 %v1271_v13, %v1271_v13  ;;  %v1273_v16 = vpop.f32.mrb[17].mxu1 }
 0x76d   :  { %v1284_v17 = vrot.slane %v1273_v16, 4  ;;  %v1293_v18 = vmul.f32 %v1273_v16, %v1273_v16  ;;  %v1275_v19 = vpop.f32.mrb[18].mxu1 }
 0x76e   :  { %v1279_v20 = vadd.f32 %v1278_v14, %v1271_v13  ;;  %v1294_v21 = vrot.slane %v1292_v15, 4  ;;  %v1276_v22 = vpop.f32.mrb[19].mxu1 }
 0x76f   :  { %v1285_v23 = vadd.f32 %v1284_v17, %v1273_v16  ;;  %v1300_v24 = vrot.slane %v1293_v18, 4 }
 0x770   :  { %v1280_v25 = vrot.slane %v1279_v20, 2  ;;  %v1295_v26 = vadd.f32 %v1294_v21, %v1292_v15 }
 0x771   :  { %v1286_v27 = vrot.slane %v1285_v23, 2  ;;  %v1301_v28 = vadd.f32 %v1300_v24, %v1293_v18 }
 0x772   :  { %v1281_v29 = vadd.f32 %v1280_v25, %v1279_v20  ;;  %v1296_v30 = vrot.slane %v1295_v26, 2 }
 0x773   :  { %v1287_v31 = vadd.f32 %v1286_v27, %v1285_v23  ;;  %v1302_v33 = vrot.slane %v1301_v28, 2 }
 0x774   :  { %v1282_v35 = vrot.slane %v1281_v29, 1  ;;  %v1297_v36 = vadd.f32 %v1296_v30, %v1295_v26 }
 0x775   :  { %v1288_v5 = vrot.slane %v1287_v31, 1  ;;  %v1303_v37 = vadd.f32 %v1302_v33, %v1301_v28 }
 0x776   :  { %v1283_v38 = vadd.f32 %v1282_v35, %v1281_v29  ;;  %v1298_v39 = vrot.slane %v1297_v36, 1 }
 0x777   :  { %v1289_v40 = vadd.f32 %v1288_v5, %v1287_v31  ;;  %v1304_v41 = vrot.slane %v1303_v37, 1 }
 0x778   :  { %v1290_v42 = vmul.f32 0.125, %v1283_v38  ;;  %v1299_v43 = vadd.f32 %v1298_v39, %v1297_v36 }
 0x779   :  { %v1291_v44 = vmul.f32 0.125, %v1289_v40  ;;  %v1305_v45 = vadd.f32 %v1304_v41, %v1303_v37 }
 0x77a   :  { %v1306_v47 = vmul.f32 0.125, %v1299_v43  ;;  %v1308_v48 = vmul.f32 %v1290_v42, %v1290_v42 }
 0x77b   :  { %v1307_v49 = vmul.f32 0.125, %v1305_v45  ;;  %v1309_v50 = vmul.f32 %v1291_v44, %v1291_v44 }
 0x77c   :  { %v1310_v51 = vsub.f32 %v1306_v47, %v1308_v48 }
 0x77d   :  { %v1311_v53 = vsub.f32 %v1307_v49, %v1309_v50 }
 0x77e   :  { %v1312_v54 = vmax.f32 %v1310_v51, 0.0 }
 0x77f   :  { %v1313_v56 = vmax.f32 %v1311_v53, 0.0 }
 0x780   :  { %v1314_v57 = vadd.f32 1e-05, %v1312_v54 }
 0x781   :  { %v1315_v58 = vadd.f32 1e-05, %v1313_v56 }
 0x782   :  { %2212 = vrsqrt.f32 %v1314_v57 }
 0x783   :  { %2214 = vrsqrt.f32 %v1315_v58 }
 0x78c   :  { %v2213_v62 = vpop.eup %2212 }
 0x78d   :  { %v2215_v63 = vpop.eup %2214  ;;  %v1329_v0 = vmul.f32 %v2213_v62, %v1322_v60 }
 0x78e   :  { %v1330_v1 = vmul.f32 %v2215_v63, %v1326_v61 }
 0x78f   :  { %v1331_v2 = vmul.f32 %v1329_v0, %v1290_v42  ;;  %v1355_v6 = vrot.slane %v1329_v0, %v2424_v32 }
 0x790   :  { %v1332_v3 = vmul.f32 %v1330_v1, %v1291_v44  ;;  %v1359_v7 = vrot.slane %v1330_v1, %v2424_v32 }
 0x791   :  { %v1360_v10 = vmul.f32 %v1355_v6, %v1271_v13 }
 0x792   :  { %v1335_v4 = vcombine.low %v1331_v2, %v1332_v3  ;;  %v1361_v11 = vmul.f32 %v1359_v7, %v1273_v16 }
 0x794   :  { %v1342_v52 = vrot.slane %v1335_v4, %v2430_v46 }
 0x796   :  { %v1349_v8 = vrot.slane %v1342_v52, %v2430_v46 }
 0x798   :  { %v1351_v9 = vsub.f32 %v1155_v55, %v1349_v8 }
 0x79a   :  { %v1370_v12 = vrot.slane %v1351_v9, %v2426_v34  ;;  %v1366_v14 = vrot.slane %v1351_v9, %v2424_v32 }
 0x79c   :  { %v1374_v15 = vadd.f32 %v1370_v12, %v1361_v11  ;;  %v1373_v17 = vadd.f32 %v1366_v14, %v1360_v10 }
 0x79e   :  { %v1376_v18 = vmul.f32 0.01, %v1374_v15  ;;  %v1375_v19 = vmul.f32 0.01, %v1373_v17 }
 0x7a0   :  { %v1378_v20 = vmax.f32 %v1374_v15, %v1376_v18  ;;  %v1377_v21 = vmax.f32 %v1373_v17, %v1375_v19 }
 0x7a2   :  { %v1416_v22 = vpack.c.bf16 %v1378_v20, %v1378_v20  ;;  %v1415_v23 = vpack.c.bf16 %v1377_v21, %v1377_v21 }
 0x7a4   :  { %1609 = vmatprep.mubr.bf16.mxu0 %v1416_v22 }
 0x7a5   :  { %1610 = vmatmul.mubr.bf16.vlgmr.msra.gmra.mrb[8].mxu0 %v1415_v23 }
 0x7a6   :  { %2297 = shalt.err (!%p2294_p0)
}
 0x7a7   :  { %s2298_s5 = scalar_lea.hbm %s2524_s4, 128 }
 0x7a8   :  { %p2299_p1 = scmp.ne.s32.totalorder %s2524_s4, %s2298_s5  ;;  %p2302_p2 = scmp.lt.u32.totalorder %s2298_s5, %s2524_s4 }
 0x7aa   :  { %p2304_p3 = pnand %p2302_p2, %p2299_p1 }
 0x7ac   :  { %2307 = shalt.err (!%p2304_p3)
}
 0x7ad   :  { %1740 = dma.vmem_to_hbm [thread:$0]  %s1738_s27, 128, %s2524_s4, [#allocation10]   ;;  %v1412_v4 = vld [vmem:[#allocation7 + $0x16] ss:$8 sm:$0x3] }
 0x7ae   :  { %v1662_v52 = vrot.slane %v1412_v4, %v2424_v32  ;;  %v1666_v55 = vrot.slane %v1412_v4, %v2426_v34  ;;  %v1414_v15 = vld [vmem:[#allocation7 + $0x17] ss:$8 sm:$0x3]  ;;  %s2350_s4 = smov [#allocation8]  }
 0x7af   :  { %s1727_s12 = sshll.u32 %s2350_s4, 4  ;;  %s1728_s12 = int_to_ptr.vmem [resolvable:$true] %s1727_s12 }
 0x7b0   :  { %s2308_s13 = scalar_lea.vmem %s1728_s12, 256  ;;  %p2313_p5 = scmp.lt.s32.totalorder %s1728_s12, %s1728_s12 }
 0x7b1   :  { %p2309_p4 = scmp.ne.s32.totalorder %s1728_s12, %s2308_s13  ;;  %p2314_p6 = scmp.lt.s32.totalorder %s2308_s13, %s2308_s13 }
 0x7b3   :  { %p2315_p7 = por %p2314_p6, %p2313_p5 }
 0x7b5   :  { %p2316_p8 = pnand %p2315_p7, %p2309_p4 }
 0x878   :  { %v1611_v13 = vpop.f32.mrb[8].mxu0 }
 0x879   :  { %v1618_v16 = vrot.slane %v1611_v13, 4  ;;  %v1632_v24 = vmul.f32 %v1611_v13, %v1611_v13  ;;  %v1613_v25 = vpop.f32.mrb[9].mxu0 }
 0x87a   :  { %v1624_v26 = vrot.slane %v1613_v25, 4  ;;  %v1633_v27 = vmul.f32 %v1613_v25, %v1613_v25  ;;  %v1615_v28 = vpop.f32.mrb[10].mxu0 }
 0x87b   :  { %v1619_v29 = vadd.f32 %v1618_v16, %v1611_v13  ;;  %v1634_v30 = vrot.slane %v1632_v24, 4  ;;  %v1616_v31 = vpop.f32.mrb[11].mxu0 }
 0x87c   :  { %v1625_v33 = vadd.f32 %v1624_v26, %v1613_v25  ;;  %v1640_v35 = vrot.slane %v1633_v27, 4 }
 0x87d   :  { %v1620_v36 = vrot.slane %v1619_v29, 2  ;;  %v1635_v5 = vadd.f32 %v1634_v30, %v1632_v24 }
 0x87e   :  { %v1626_v37 = vrot.slane %v1625_v33, 2  ;;  %v1641_v38 = vadd.f32 %v1640_v35, %v1633_v27 }
 0x87f   :  { %v1621_v39 = vadd.f32 %v1620_v36, %v1619_v29  ;;  %v1636_v40 = vrot.slane %v1635_v5, 2 }
 0x880   :  { %v1627_v41 = vadd.f32 %v1626_v37, %v1625_v33  ;;  %v1642_v42 = vrot.slane %v1641_v38, 2 }
 0x881   :  { %v1622_v43 = vrot.slane %v1621_v39, 1  ;;  %v1637_v44 = vadd.f32 %v1636_v40, %v1635_v5 }
 0x882   :  { %v1628_v45 = vrot.slane %v1627_v41, 1  ;;  %v1643_v47 = vadd.f32 %v1642_v42, %v1641_v38 }
 0x883   :  { %v1623_v48 = vadd.f32 %v1622_v43, %v1621_v39  ;;  %v1638_v49 = vrot.slane %v1637_v44, 1 }
 0x884   :  { %v1629_v50 = vadd.f32 %v1628_v45, %v1627_v41  ;;  %v1644_v51 = vrot.slane %v1643_v47, 1 }
 0x885   :  { %v1630_v53 = vmul.f32 0.125, %v1623_v48  ;;  %v1639_v54 = vadd.f32 %v1638_v49, %v1637_v44 }
 0x886   :  { %v1631_v56 = vmul.f32 0.125, %v1629_v50  ;;  %v1645_v57 = vadd.f32 %v1644_v51, %v1643_v47 }
 0x887   :  { %v1646_v58 = vmul.f32 0.125, %v1639_v54  ;;  %v1648_v59 = vmul.f32 %v1630_v53, %v1630_v53 }
 0x888   :  { %v1647_v60 = vmul.f32 0.125, %v1645_v57  ;;  %v1649_v61 = vmul.f32 %v1631_v56, %v1631_v56 }
 0x889   :  { %v1650_v62 = vsub.f32 %v1646_v58, %v1648_v59 }
 0x88a   :  { %v1651_v63 = vsub.f32 %v1647_v60, %v1649_v61 }
 0x88b   :  { %v1652_v0 = vmax.f32 %v1650_v62, 0.0 }
 0x88c   :  { %v1653_v1 = vmax.f32 %v1651_v63, 0.0 }
 0x88d   :  { %v1654_v2 = vadd.f32 1e-05, %v1652_v0 }
 0x88e   :  { %v1655_v3 = vadd.f32 1e-05, %v1653_v1 }
 0x88f   :  { %2216 = vrsqrt.f32 %v1654_v2 }
 0x890   :  { %2218 = vrsqrt.f32 %v1655_v3 }
 0x899   :  { %v2217_v6 = vpop.eup %2216 }
 0x89a   :  { %v2219_v7 = vpop.eup %2218  ;;  %v1669_v8 = vmul.f32 %v2217_v6, %v1662_v52 }
 0x89b   :  { %v1670_v9 = vmul.f32 %v2219_v7, %v1666_v55 }
 0x89c   :  { %v1671_v10 = vmul.f32 %v1669_v8, %v1630_v53  ;;  %v1695_v17 = vrot.slane %v1669_v8, %v2424_v32 }
 0x89d   :  { %v1672_v11 = vmul.f32 %v1670_v9, %v1631_v56  ;;  %v1699_v18 = vrot.slane %v1670_v9, %v2424_v32 }
 0x89e   :  { %v1700_v21 = vmul.f32 %v1695_v17, %v1611_v13 }
 0x89f   :  { %v1675_v12 = vcombine.low %v1671_v10, %v1672_v11  ;;  %v1701_v22 = vmul.f32 %v1699_v18, %v1613_v25 }
 0x8a1   :  { %v1682_v14 = vrot.slane %v1675_v12, %v2430_v46 }
 0x8a3   :  { %v1689_v19 = vrot.slane %v1682_v14, %v2430_v46 }
 0x8a5   :  { %v1691_v20 = vsub.f32 %v1414_v15, %v1689_v19 }
 0x8a7   :  { %v1706_v23 = vrot.slane %v1691_v20, %v2424_v32  ;;  %v1710_v16 = vrot.slane %v1691_v20, %v2426_v34 }
 0x8a9   :  { %v1713_v24 = vadd.f32 %v1706_v23, %v1700_v21  ;;  %v1714_v26 = vadd.f32 %v1710_v16, %v1701_v22 }
 0x8ab   :  { %v1715_v27 = vmul.f32 0.01, %v1713_v24  ;;  %v1716_v28 = vmul.f32 0.01, %v1714_v26 }
 0x8ad   :  { %v1717_v29 = vmax.f32 %v1713_v24, %v1715_v27  ;;  %v1718_v30 = vmax.f32 %v1714_v26, %v1716_v28 }
 0x8af   :  { %1719 = vst [vmem:[#allocation8] sm:$0xff] %v1717_v29  ;;  %1720 = vst [vmem:[#allocation8 + $0x8] sm:$0xff] %v1718_v30 }
 0x8b0   :  { %2319 = shalt.err (!%p2316_p8)
}
 0x8b1   :  { %s2320_s15 = scalar_lea.hbm %s2523_s3, 256 }
 0x8b2   :  { %p2321_p9 = scmp.ne.s32.totalorder %s2523_s3, %s2320_s15  ;;  %p2324_p10 = scmp.lt.u32.totalorder %s2320_s15, %s2523_s3 }
 0x8b4   :  { %p2326_p11 = pnand %p2324_p10, %p2321_p9 }
 0x8b6   :  { %2329 = shalt.err (!%p2326_p11)
}
 0x8b7   :  { %1730 = dma.vmem_to_hbm [thread:$0]  %s1728_s12, 256, %s2523_s3, [#allocation4]  }
 0x8b8   :  { %2334 = dma.done.wait [#allocation4], 256  }
 0x8b9   :  { %2335 = vsyncadd [#allocation4], 4294967040 }
 0x8ba   :  { %2336 = dma.done.wait [#allocation10], 128  }
 0x8bb   :  { %2337 = vsyncadd [#allocation10], 4294967168 }
 0x8bc   :  { %1747 = vsyncpa [#allocation3], 1 }
 0x8bd   :  { %1748 = vsyncpa [#allocation6], 1 }
 0x8be   :  { %1749 = vsyncpa [#allocation4], 1 }
 0x8bf   :  { %1750 = vsyncpa [#allocation10], 1 }

</bundles_post_ra>
